<compile_context>
chip_gen: v7x
topology: tpu7x:2x2x1
jax: 0.10.0
libtpu: 0.0.40
codegen_flags: <defaults>
</compile_context>

<pallas_src>
import functools
import math

import numpy as np
import jax
import jax.numpy as jnp
from jax.experimental import pallas as pl
from jax.experimental.pallas import tpu as pltpu


LANE = 128      # pad hidden / feature dims to this many lanes
SUBLANE = 16    # pad per-chunk atom / bond counts to this (bf16-friendly sublanes)


def _round_up(x, m):
    return (x + m - 1) // m * m


# -----------------------------------------------------------------------------
# Pallas kernel: one molecule chunk of the MPN encoder forward.
# -----------------------------------------------------------------------------
def mpn_chunk_kernel(
    f_atoms_ref,   # (TA, AF)   f32   chunk atom features (zero-padded rows/cols)
    f_bonds_ref,   # (TB, BF)   f32   chunk directed-bond features
    w_i_ref,       # (BF, H)    f32
    w_h_ref,       # (H, H)     bf16
    w_o_a_ref,     # (AF, H)    f32   top rows of W_o (atom-feature part)
    w_o_m_ref,     # (H, H)     f32   bottom rows of W_o (message part)
    b_o_ref,       # (1, H)     f32
    a2b_ref,       # (TA, TB)   bf16  A[a,b]=1 if bond b is incoming to atom a
    b2a_ref,       # (TB, TA)   bf16  G[b,a]=1 if bond b originates at atom a
    scope_ref,     # (TM, TA)   f32   S[m,a]=1/a_size if atom a in molecule m
    out_ref,       # (1, TM, H) f32
    *,
    depth: int,
):
    A = a2b_ref[...]          # bf16 0/1 (exact)
    G = b2a_ref[...]          # bf16 0/1 (exact)
    w_h = w_h_ref[...]        # bf16

    # input = W_i(f_bonds); message = ReLU(input)   (kept in f32)
    inp = jnp.dot(f_bonds_ref[...], w_i_ref[...],
                  preferred_element_type=jnp.float32)
    message = jnp.maximum(inp, 0.0)

    # Reverse bonds are packed as adjacent pairs (2k, 2k+1): rev[b] = msg[b ^ 1].
    tb, h = message.shape
    row = jax.lax.broadcasted_iota(jnp.int32, (tb, h), 0)
    even_row = jnp.bitwise_and(row, 1) == 0

    # Message passing (depth - 1 rounds), bond-message variant.  depth is small
    # and static -> Python unroll; use lax.fori_loop if depth were large.
    for _ in range(depth - 1):
        msg_bf = message.astype(jnp.bfloat16)
        # a_message[a] = sum over incoming bonds b of message[b]
        a_msg = jnp.dot(A, msg_bf, preferred_element_type=jnp.float32)
        # rev_message = message[b2revb]  == adjacent-row pair swap (XLU rolls)
        down = pltpu.roll(message, tb - 1, axis=0)   # down[i] = message[i + 1]
        up = pltpu.roll(message, 1, axis=0)          # up[i]   = message[i - 1]
        rev = jnp.where(even_row, down, up)
        # message = a_message[b2a] - rev_message
        new = jnp.dot(G, a_msg.astype(jnp.bfloat16),
                      preferred_element_type=jnp.float32) - rev
        # message = W_h(message); message = ReLU(input + message)
        new = jnp.dot(new.astype(jnp.bfloat16), w_h,
                      preferred_element_type=jnp.float32)
        message = jnp.maximum(inp + new, 0.0)
        # TODO(synk): dropout_layer omitted (identity in eval mode / p=0)

    # Readout: a_message = sum of incoming bond messages per atom.
    a_msg = jnp.dot(A, message.astype(jnp.bfloat16),
                    preferred_element_type=jnp.float32)
    # atom_hiddens = ReLU(W_o(cat[f_atoms, a_message]) + b_o); split matmul = concat.
    atom_h = (
        jnp.dot(f_atoms_ref[...], w_o_a_ref[...],
                preferred_element_type=jnp.float32)
        + jnp.dot(a_msg, w_o_m_ref[...], preferred_element_type=jnp.float32)
        + b_o_ref[...]
    )
    atom_h = jnp.maximum(atom_h, 0.0)

    # Per-molecule mean aggregation (1/a_size already folded into scope rows).
    out_ref[0, :, :] = jnp.dot(scope_ref[...], atom_h,
                               preferred_element_type=jnp.float32)


# -----------------------------------------------------------------------------
# Wrapper: pads params to 128 lanes, sets up the per-chunk grid, slices output.
# -----------------------------------------------------------------------------
def mpn_encoder_pallas(chunked, params, depth, n_mols, hidden):
    f_atoms_c, f_bonds_c, a2b_c, b2a_c, scope_c = chunked
    w_i, w_h, w_o_a, w_o_m, b_o = params       # logical (unpadded) shapes

    n_chunks, TA, AF = f_atoms_c.shape
    _, TB, BF = f_bonds_c.shape
    TM = scope_c.shape[1]
    H = LANE

    def pad2(w, rows, cols, dtype=jnp.float32):
        out = jnp.zeros((rows, cols), dtype)
        return out.at[: w.shape[0], : w.shape[1]].set(w.astype(dtype))

    w_i_p = pad2(w_i, BF, H)
    w_h_p = pad2(w_h, H, H, jnp.bfloat16)       # bf16 operand inside the loop
    w_o_a_p = pad2(w_o_a, AF, H)
    w_o_m_p = pad2(w_o_m, H, H)
    b_o_p = pad2(b_o, 1, H)

    # Explicit VMEM budget: double-buffered chunk tiles + resident weights.
    def nbytes(*arrs):
        return sum(int(np.prod(a.shape)) * a.dtype.itemsize for a in arrs)

    chunk_bytes = nbytes(f_atoms_c[0], f_bonds_c[0], a2b_c[0], b2a_c[0],
                         scope_c[0]) + TM * H * 4
    weight_bytes = nbytes(w_i_p, w_h_p, w_o_a_p, w_o_m_p, b_o_p)
    vmem_limit = int(min(100 * 2**20,
                         max(16 * 2**20,
                             4 * chunk_bytes + 2 * weight_bytes + 2**20)))

    def chunk_spec(shape):
        return pl.BlockSpec((None,) + shape, lambda c: (c, 0, 0))

    def full_spec(shape):
        return pl.BlockSpec(shape, lambda c, _n=len(shape): (0,) * _n)

    out = pl.pallas_call(
        functools.partial(mpn_chunk_kernel, depth=depth),
        out_shape=jax.ShapeDtypeStruct((n_chunks, TM, H), jnp.float32),
        grid=(n_chunks,),
        in_specs=[
            chunk_spec((TA, AF)),     # f_atoms chunks
            chunk_spec((TB, BF)),     # f_bonds chunks
            full_spec((BF, H)),       # W_i
            full_spec((H, H)),        # W_h (bf16)
            full_spec((AF, H)),       # W_o atom part
            full_spec((H, H)),        # W_o message part
            full_spec((1, H)),        # b_o
            chunk_spec((TA, TB)),     # A (incoming-bond incidence, bf16)
            chunk_spec((TB, TA)),     # G (bond-source incidence, bf16)
            chunk_spec((TM, TA)),     # S (mean-pooling scope)
        ],
        out_specs=pl.BlockSpec((1, TM, H), lambda c: (c, 0, 0)),
        compiler_params=pltpu.CompilerParams(
            dimension_semantics=("parallel",),   # chunks are independent -> megacore
            vmem_limit_bytes=vmem_limit,
        ),
    )(f_atoms_c, f_bonds_c, w_i_p, w_h_p, w_o_a_p, w_o_m_p, b_o_p,
      a2b_c, b2a_c, scope_c)

    # (n_chunks, TM, H) -> (n_mols, hidden): chunk-major row order == molecule order.
    return out.reshape(n_chunks * TM, H)[:n_mols, :hidden]


# -----------------------------------------------------------------------------
# Pure-JAX reference mirroring the PyTorch forward (gather-based), f32, unpadded.
# -----------------------------------------------------------------------------
def mpn_encoder_ref(f_atoms, f_bonds, a2b, b2a, b2revb, a_scope,
                    w_i, w_h, w_o, b_o, depth):
    inp = f_bonds @ w_i
    message = jax.nn.relu(inp)
    for _ in range(depth - 1):
        nei_a_message = message[a2b]            # (n_atoms, max_nb, hidden)
        a_message = nei_a_message.sum(axis=1)   # (n_atoms, hidden)
        rev_message = message[b2revb]
        message = a_message[b2a] - rev_message
        message = message @ w_h
        message = jax.nn.relu(inp + message)
    nei_a_message = message[a2b]
    a_message = nei_a_message.sum(axis=1)
    a_input = jnp.concatenate([f_atoms, a_message], axis=1)
    atom_hiddens = jax.nn.relu(a_input @ w_o + b_o)
    mol_vecs = []
    for (a_start, a_size) in a_scope:
        cur = atom_hiddens[a_start:a_start + a_size]
        mol_vecs.append(cur.sum(axis=0) / a_size)
    return jnp.stack(mol_vecs, axis=0)


# -----------------------------------------------------------------------------
# Synthetic molecules (chains) + two packings:
#  * flat chemprop layout (pad atom/bond 0) for the gather-based reference
#  * per-chunk padded layout (reverse pairs adjacent) for the Pallas kernel
# -----------------------------------------------------------------------------
def make_molecules(mol_sizes, key, atom_fdim, bond_fdim):
    mols = []
    for size in mol_sizes:
        key, ka, kb = jax.random.split(key, 3)
        atoms = np.asarray(jax.random.normal(ka, (size, atom_fdim), jnp.float32))
        n_edges = size - 1
        bonds = np.asarray(
            jax.random.normal(kb, (2 * n_edges, bond_fdim), jnp.float32))
        edges = [(i, i + 1) for i in range(n_edges)]
        mols.append((atoms, bonds, edges))
    return mols


def flat_graph(mols, atom_fdim, bond_fdim):
    f_atoms = [np.zeros((1, atom_fdim), np.float32)]
    f_bonds = [np.zeros((1, bond_fdim), np.float32)]
    b2a = [0]
    b_dst = [0]
    b2revb = [0]
    a_scope = []
    a_off = 1
    for atoms, bonds, edges in mols:
        size = atoms.shape[0]
        a_scope.append((a_off, size))
        f_atoms.append(atoms)
        for e, (u, v) in enumerate(edges):
            b1 = len(b2a)
            f_bonds.append(bonds[2 * e:2 * e + 1])
            b2a.append(a_off + u); b_dst.append(a_off + v)
            b2 = len(b2a)
            f_bonds.append(bonds[2 * e + 1:2 * e + 2])
            b2a.append(a_off + v); b_dst.append(a_off + u)
            b2revb += [b2, b1]
        a_off += size
    n_atoms, n_bonds = a_off, len(b2a)
    incoming = [[] for _ in range(n_atoms)]
    for b in range(1, n_bonds):
        incoming[b_dst[b]].append(b)
    max_nb = max(1, max(len(x) for x in incoming))
    a2b = np.array([x + [0] * (max_nb - len(x)) for x in incoming], np.int32)
    return (jnp.asarray(np.concatenate(f_atoms, 0)),
            jnp.asarray(np.concatenate(f_bonds, 0)),
            jnp.asarray(a2b),
            jnp.asarray(np.array(b2a, np.int32)),
            jnp.asarray(np.array(b2revb, np.int32)),
            a_scope)


def chunk_graph(mols, mols_per_chunk, atom_fdim, bond_fdim):
    TM = mols_per_chunk
    n_chunks = math.ceil(len(mols) / TM)
    chunks = [mols[c * TM:(c + 1) * TM] for c in range(n_chunks)]
    TA = _round_up(max(sum(a.shape[0] for a, _, _ in ch) for ch in chunks), SUBLANE)
    TB = _round_up(max(sum(2 * len(e) for _, _, e in ch) for ch in chunks), SUBLANE)
    AF = _round_up(atom_fdim, LANE)
    BF = _round_up(bond_fdim, LANE)

    f_atoms_c = np.zeros((n_chunks, TA, AF), np.float32)
    f_bonds_c = np.zeros((n_chunks, TB, BF), np.float32)
    A = np.zeros((n_chunks, TA, TB), np.float32)
    G = np.zeros((n_chunks, TB, TA), np.float32)
    S = np.zeros((n_chunks, TM, TA), np.float32)

    for c, ch in enumerate(chunks):
        a_off, b_off = 0, 0
        for m, (atoms, bonds, edges) in enumerate(ch):
            size = atoms.shape[0]
            f_atoms_c[c, a_off:a_off + size, :atom_fdim] = atoms
            S[c, m, a_off:a_off + size] = 1.0 / size     # mean folded into scope
            for e, (u, v) in enumerate(edges):
                b1 = b_off + 2 * e                        # u -> v
                b2 = b1 + 1                               # v -> u  (reverse pair)
                f_bonds_c[c, b1, :bond_fdim] = bonds[2 * e]
                f_bonds_c[c, b2, :bond_fdim] = bonds[2 * e + 1]
                G[c, b1, a_off + u] = 1.0
                A[c, a_off + v, b1] = 1.0
                G[c, b2, a_off + v] = 1.0
                A[c, a_off + u, b2] = 1.0
            a_off += size
            b_off += 2 * len(edges)

    return (jnp.asarray(f_atoms_c), jnp.asarray(f_bonds_c),
            jnp.asarray(A, dtype=jnp.bfloat16),
            jnp.asarray(G, dtype=jnp.bfloat16),
            jnp.asarray(S))


if __name__ == "__main__":
    atom_fdim = 16
    bond_fdim = 24
    hidden = 32
    depth = 3
    mols_per_chunk = 8
    mol_sizes = [5, 7, 4, 6, 3, 8, 5, 6, 7, 4, 6, 5]     # 12 molecules -> 2 chunks

    key = jax.random.PRNGKey(0)
    key, kmol = jax.random.split(key)
    mols = make_molecules(mol_sizes, kmol, atom_fdim, bond_fdim)

    # parameters (stored as (in, out), i.e. transposed vs torch.nn.Linear)
    k1, k2, k3, k4, k5 = jax.random.split(key, 5)
    w_i = 0.1 * jax.random.normal(k1, (bond_fdim, hidden), jnp.float32)
    w_h = 0.1 * jax.random.normal(k2, (hidden, hidden), jnp.float32)
    w_o_a = 0.1 * jax.random.normal(k3, (atom_fdim, hidden), jnp.float32)
    w_o_m = 0.1 * jax.random.normal(k4, (hidden, hidden), jnp.float32)
    b_o = 0.1 * jax.random.normal(k5, (1, hidden), jnp.float32)
    params = (w_i, w_h, w_o_a, w_o_m, b_o)

    chunked = chunk_graph(mols, mols_per_chunk, atom_fdim, bond_fdim)
    out = mpn_encoder_pallas(chunked, params, depth,
                             n_mols=len(mol_sizes), hidden=hidden)
    out = jax.block_until_ready(out)

    # correctness check vs. gather-based f32 reference of the PyTorch forward
    f_atoms, f_bonds, a2b, b2a, b2revb, a_scope = flat_graph(
        mols, atom_fdim, bond_fdim)
    w_o_full = jnp.concatenate([w_o_a, w_o_m], axis=0)
    ref = mpn_encoder_ref(f_atoms, f_bonds, a2b, b2a, b2revb, a_scope,
                          w_i, w_h, w_o_full, b_o[0], depth)
    assert out.shape == (len(mol_sizes), hidden)
    # bf16 incidence / message MXU operands -> small rounding vs the f32 reference
    assert jnp.allclose(out, ref, atol=3e-2, rtol=3e-2), \
        float(jnp.max(jnp.abs(out - ref)))

    print("KERNEL_OK")
</pallas_src>

<mosaic_0001>
module attributes {stable_mosaic.version = 11 : i64} {
  func.func @mpn_chunk_kernel(%arg0: i32, %arg1: memref<1x48x128xf32, #tpu.memory_space<vmem>>, %arg2: memref<1x80x128xf32, #tpu.memory_space<vmem>>, %arg3: memref<128x128xf32, #tpu.memory_space<vmem>>, %arg4: memref<128x128xbf16, #tpu.memory_space<vmem>>, %arg5: memref<128x128xf32, #tpu.memory_space<vmem>>, %arg6: memref<128x128xf32, #tpu.memory_space<vmem>>, %arg7: memref<1x128xf32, #tpu.memory_space<vmem>>, %arg8: memref<1x48x80xbf16, #tpu.memory_space<vmem>>, %arg9: memref<1x80x48xbf16, #tpu.memory_space<vmem>>, %arg10: memref<1x8x48xf32, #tpu.memory_space<vmem>>, %arg11: memref<1x8x128xf32, #tpu.memory_space<vmem>>) attributes {dimension_semantics = [#tpu.dimension_semantics<parallel>], iteration_bounds = array<i64: 2>, scalar_prefetch = 0 : i64, scratch_operands = 0 : i64, tpu.core_type = #tpu.core_type<tc>, window_params = [{transform_indices = @transform_0, window_bounds = array<i64: 1, 48, 128>}, {transform_indices = @transform_1, window_bounds = array<i64: 1, 80, 128>}, {pipeline_mode = #tpu.pipeline_mode<synchronous>, transform_indices = @transform_2, window_bounds = array<i64: 128, 128>}, {pipeline_mode = #tpu.pipeline_mode<synchronous>, transform_indices = @transform_3, window_bounds = array<i64: 128, 128>}, {pipeline_mode = #tpu.pipeline_mode<synchronous>, transform_indices = @transform_4, window_bounds = array<i64: 128, 128>}, {pipeline_mode = #tpu.pipeline_mode<synchronous>, transform_indices = @transform_5, window_bounds = array<i64: 128, 128>}, {pipeline_mode = #tpu.pipeline_mode<synchronous>, transform_indices = @transform_6, window_bounds = array<i64: 1, 128>}, {transform_indices = @transform_7, window_bounds = array<i64: 1, 48, 80>}, {transform_indices = @transform_8, window_bounds = array<i64: 1, 80, 48>}, {transform_indices = @transform_9, window_bounds = array<i64: 1, 8, 48>}, {transform_indices = @transform_10, window_bounds = array<i64: 1, 8, 128>}]} {
    %c0 = arith.constant 0 : index
    %c0_0 = arith.constant 0 : index
    %c0_1 = arith.constant 0 : index
    %0 = vector.load %arg8[%c0, %c0_0, %c0_1] : memref<1x48x80xbf16, #tpu.memory_space<vmem>>, vector<1x48x80xbf16>
    %1 = vector.shape_cast %0 : vector<1x48x80xbf16> to vector<48x80xbf16>
    %c0_2 = arith.constant 0 : index
    %c0_3 = arith.constant 0 : index
    %c0_4 = arith.constant 0 : index
    %2 = vector.load %arg9[%c0_2, %c0_3, %c0_4] : memref<1x80x48xbf16, #tpu.memory_space<vmem>>, vector<1x80x48xbf16>
    %3 = vector.shape_cast %2 : vector<1x80x48xbf16> to vector<80x48xbf16>
    %c0_5 = arith.constant 0 : index
    %c0_6 = arith.constant 0 : index
    %4 = vector.load %arg4[%c0_5, %c0_6] : memref<128x128xbf16, #tpu.memory_space<vmem>>, vector<128x128xbf16>
    %c0_7 = arith.constant 0 : index
    %c0_8 = arith.constant 0 : index
    %c0_9 = arith.constant 0 : index
    %5 = vector.load %arg2[%c0_7, %c0_8, %c0_9] : memref<1x80x128xf32, #tpu.memory_space<vmem>>, vector<1x80x128xf32>
    %6 = vector.shape_cast %5 : vector<1x80x128xf32> to vector<80x128xf32>
    %c0_10 = arith.constant 0 : index
    %c0_11 = arith.constant 0 : index
    %7 = vector.load %arg3[%c0_10, %c0_11] : memref<128x128xf32, #tpu.memory_space<vmem>>, vector<128x128xf32>
    %cst = arith.constant dense<0.000000e+00> : vector<80x128xf32>
    %8 = tpu.matmul %6, %7, %cst {dimension_numbers = #tpu.dot_dimension_numbers<[1], [0], [0], [1], [0, 0, 1, 1], [], []>} : vector<80x128xf32>, vector<128x128xf32>, vector<80x128xf32> -> vector<80x128xf32>
    %cst_12 = arith.constant 0.000000e+00 : f32
    %9 = vector.broadcast %cst_12 : f32 to vector<80x128xf32>
    %10 = arith.maximumf %8, %9 : vector<80x128xf32>
    %11 = tpu.iota {dimensions = array<i32: 0>} : vector<80x128xi32>
    %c1_i32 = arith.constant 1 : i32
    %12 = vector.broadcast %c1_i32 : i32 to vector<80x128xi32>
    %13 = arith.andi %11, %12 : vector<80x128xi32>
    %c0_i32 = arith.constant 0 : i32
    %14 = vector.broadcast %c0_i32 : i32 to vector<80x128xi32>
    %15 = arith.cmpi eq, %13, %14 : vector<80x128xi32>
    %16 = arith.truncf %10 : vector<80x128xf32> to vector<80x128xbf16>
    %cst_13 = arith.constant dense<0.000000e+00> : vector<48x128xf32>
    %17 = tpu.matmul %1, %16, %cst_13 {dimension_numbers = #tpu.dot_dimension_numbers<[1], [0], [0], [1], [0, 0, 1, 1], [], []>} : vector<48x80xbf16>, vector<80x128xbf16>, vector<48x128xf32> -> vector<48x128xf32>
    %c79_i32 = arith.constant 79 : i32
    %18 = tpu.dynamic_rotate %10 by %c79_i32 dim 0 : vector<80x128xf32>, i32 -> vector<80x128xf32>
    %c1_i32_14 = arith.constant 1 : i32
    %19 = tpu.dynamic_rotate %10 by %c1_i32_14 dim 0 : vector<80x128xf32>, i32 -> vector<80x128xf32>
    %20 = arith.select %15, %18, %19 : vector<80x128xi1>, vector<80x128xf32>
    %21 = arith.truncf %17 : vector<48x128xf32> to vector<48x128xbf16>
    %cst_15 = arith.constant dense<0.000000e+00> : vector<80x128xf32>
    %22 = tpu.matmul %3, %21, %cst_15 {dimension_numbers = #tpu.dot_dimension_numbers<[1], [0], [0], [1], [0, 0, 1, 1], [], []>} : vector<80x48xbf16>, vector<48x128xbf16>, vector<80x128xf32> -> vector<80x128xf32>
    %23 = arith.subf %22, %20 : vector<80x128xf32>
    %24 = arith.truncf %23 : vector<80x128xf32> to vector<80x128xbf16>
    %cst_16 = arith.constant dense<0.000000e+00> : vector<80x128xf32>
    %25 = tpu.matmul %24, %4, %cst_16 {dimension_numbers = #tpu.dot_dimension_numbers<[1], [0], [0], [1], [0, 0, 1, 1], [], []>} : vector<80x128xbf16>, vector<128x128xbf16>, vector<80x128xf32> -> vector<80x128xf32>
    %26 = arith.addf %8, %25 : vector<80x128xf32>
    %cst_17 = arith.constant 0.000000e+00 : f32
    %27 = vector.broadcast %cst_17 : f32 to vector<80x128xf32>
    %28 = arith.maximumf %26, %27 : vector<80x128xf32>
    %29 = arith.truncf %28 : vector<80x128xf32> to vector<80x128xbf16>
    %cst_18 = arith.constant dense<0.000000e+00> : vector<48x128xf32>
    %30 = tpu.matmul %1, %29, %cst_18 {dimension_numbers = #tpu.dot_dimension_numbers<[1], [0], [0], [1], [0, 0, 1, 1], [], []>} : vector<48x80xbf16>, vector<80x128xbf16>, vector<48x128xf32> -> vector<48x128xf32>
    %c79_i32_19 = arith.constant 79 : i32
    %31 = tpu.dynamic_rotate %28 by %c79_i32_19 dim 0 : vector<80x128xf32>, i32 -> vector<80x128xf32>
    %c1_i32_20 = arith.constant 1 : i32
    %32 = tpu.dynamic_rotate %28 by %c1_i32_20 dim 0 : vector<80x128xf32>, i32 -> vector<80x128xf32>
    %33 = arith.select %15, %31, %32 : vector<80x128xi1>, vector<80x128xf32>
    %34 = arith.truncf %30 : vector<48x128xf32> to vector<48x128xbf16>
    %cst_21 = arith.constant dense<0.000000e+00> : vector<80x128xf32>
    %35 = tpu.matmul %3, %34, %cst_21 {dimension_numbers = #tpu.dot_dimension_numbers<[1], [0], [0], [1], [0, 0, 1, 1], [], []>} : vector<80x48xbf16>, vector<48x128xbf16>, vector<80x128xf32> -> vector<80x128xf32>
    %36 = arith.subf %35, %33 : vector<80x128xf32>
    %37 = arith.truncf %36 : vector<80x128xf32> to vector<80x128xbf16>
    %cst_22 = arith.constant dense<0.000000e+00> : vector<80x128xf32>
    %38 = tpu.matmul %37, %4, %cst_22 {dimension_numbers = #tpu.dot_dimension_numbers<[1], [0], [0], [1], [0, 0, 1, 1], [], []>} : vector<80x128xbf16>, vector<128x128xbf16>, vector<80x128xf32> -> vector<80x128xf32>
    %39 = arith.addf %8, %38 : vector<80x128xf32>
    %cst_23 = arith.constant 0.000000e+00 : f32
    %40 = vector.broadcast %cst_23 : f32 to vector<80x128xf32>
    %41 = arith.maximumf %39, %40 : vector<80x128xf32>
    %42 = arith.truncf %41 : vector<80x128xf32> to vector<80x128xbf16>
    %cst_24 = arith.constant dense<0.000000e+00> : vector<48x128xf32>
    %43 = tpu.matmul %1, %42, %cst_24 {dimension_numbers = #tpu.dot_dimension_numbers<[1], [0], [0], [1], [0, 0, 1, 1], [], []>} : vector<48x80xbf16>, vector<80x128xbf16>, vector<48x128xf32> -> vector<48x128xf32>
    %c0_25 = arith.constant 0 : index
    %c0_26 = arith.constant 0 : index
    %c0_27 = arith.constant 0 : index
    %44 = vector.load %arg1[%c0_25, %c0_26, %c0_27] : memref<1x48x128xf32, #tpu.memory_space<vmem>>, vector<1x48x128xf32>
    %45 = vector.shape_cast %44 : vector<1x48x128xf32> to vector<48x128xf32>
    %c0_28 = arith.constant 0 : index
    %c0_29 = arith.constant 0 : index
    %46 = vector.load %arg5[%c0_28, %c0_29] : memref<128x128xf32, #tpu.memory_space<vmem>>, vector<128x128xf32>
    %cst_30 = arith.constant dense<0.000000e+00> : vector<48x128xf32>
    %47 = tpu.matmul %45, %46, %cst_30 {dimension_numbers = #tpu.dot_dimension_numbers<[1], [0], [0], [1], [0, 0, 1, 1], [], []>} : vector<48x128xf32>, vector<128x128xf32>, vector<48x128xf32> -> vector<48x128xf32>
    %c0_31 = arith.constant 0 : index
    %c0_32 = arith.constant 0 : index
    %48 = vector.load %arg6[%c0_31, %c0_32] : memref<128x128xf32, #tpu.memory_space<vmem>>, vector<128x128xf32>
    %cst_33 = arith.constant dense<0.000000e+00> : vector<48x128xf32>
    %49 = tpu.matmul %43, %48, %cst_33 {dimension_numbers = #tpu.dot_dimension_numbers<[1], [0], [0], [1], [0, 0, 1, 1], [], []>} : vector<48x128xf32>, vector<128x128xf32>, vector<48x128xf32> -> vector<48x128xf32>
    %50 = arith.addf %47, %49 : vector<48x128xf32>
    %c0_34 = arith.constant 0 : index
    %c0_35 = arith.constant 0 : index
    %51 = vector.load %arg7[%c0_34, %c0_35] : memref<1x128xf32, #tpu.memory_space<vmem>>, vector<1x128xf32>
    %52 = vector.broadcast %51 : vector<1x128xf32> to vector<48x128xf32>
    %53 = arith.addf %50, %52 : vector<48x128xf32>
    %cst_36 = arith.constant 0.000000e+00 : f32
    %54 = vector.broadcast %cst_36 : f32 to vector<48x128xf32>
    %55 = arith.maximumf %53, %54 : vector<48x128xf32>
    %c0_37 = arith.constant 0 : index
    %c0_38 = arith.constant 0 : index
    %c0_39 = arith.constant 0 : index
    %56 = vector.load %arg10[%c0_37, %c0_38, %c0_39] : memref<1x8x48xf32, #tpu.memory_space<vmem>>, vector<1x8x48xf32>
    %57 = vector.shape_cast %56 : vector<1x8x48xf32> to vector<8x48xf32>
    %cst_40 = arith.constant dense<0.000000e+00> : vector<8x128xf32>
    %58 = tpu.matmul %57, %55, %cst_40 {dimension_numbers = #tpu.dot_dimension_numbers<[1], [0], [0], [1], [0, 0, 1, 1], [], []>} : vector<8x48xf32>, vector<48x128xf32>, vector<8x128xf32> -> vector<8x128xf32>
    %c0_41 = arith.constant 0 : index
    %c0_42 = arith.constant 0 : index
    %c0_43 = arith.constant 0 : index
    %59 = vector.load %arg11[%c0_41, %c0_42, %c0_43] : memref<1x8x128xf32, #tpu.memory_space<vmem>>, vector<1x8x128xf32>
    %60 = vector.shape_cast %59 : vector<1x8x128xf32> to vector<8x128xf32>
    %61 = vector.shape_cast %58 : vector<8x128xf32> to vector<1x8x128xf32>
    tpu.vector_store %arg11[%c0_41, %c0_42, %c0_43], %61 {strides = array<i32>} : memref<1x8x128xf32, #tpu.memory_space<vmem>>, vector<1x8x128xf32>,
    return
  }
  func.func @transform_0(%arg0: i32) -> (i32, i32, i32) {
    %c0_i32 = arith.constant 0 : i32
    %c0_i32_0 = arith.constant 0 : i32
    %c0_i32_1 = arith.constant 0 : i32
    return %arg0, %c0_i32, %c0_i32_0 : i32, i32, i32
  }
  func.func @transform_1(%arg0: i32) -> (i32, i32, i32) {
    %c0_i32 = arith.constant 0 : i32
    %c0_i32_0 = arith.constant 0 : i32
    %c0_i32_1 = arith.constant 0 : i32
    return %arg0, %c0_i32, %c0_i32_0 : i32, i32, i32
  }
  func.func @transform_2(%arg0: i32) -> (i32, i32) {
    %c0_i32 = arith.constant 0 : i32
    %c0_i32_0 = arith.constant 0 : i32
    %c0_i32_1 = arith.constant 0 : i32
    return %c0_i32, %c0_i32_0 : i32, i32
  }
  func.func @transform_3(%arg0: i32) -> (i32, i32) {
    %c0_i32 = arith.constant 0 : i32
    %c0_i32_0 = arith.constant 0 : i32
    %c0_i32_1 = arith.constant 0 : i32
    return %c0_i32, %c0_i32_0 : i32, i32
  }
  func.func @transform_4(%arg0: i32) -> (i32, i32) {
    %c0_i32 = arith.constant 0 : i32
    %c0_i32_0 = arith.constant 0 : i32
    %c0_i32_1 = arith.constant 0 : i32
    return %c0_i32, %c0_i32_0 : i32, i32
  }
  func.func @transform_5(%arg0: i32) -> (i32, i32) {
    %c0_i32 = arith.constant 0 : i32
    %c0_i32_0 = arith.constant 0 : i32
    %c0_i32_1 = arith.constant 0 : i32
    return %c0_i32, %c0_i32_0 : i32, i32
  }
  func.func @transform_6(%arg0: i32) -> (i32, i32) {
    %c0_i32 = arith.constant 0 : i32
    %c0_i32_0 = arith.constant 0 : i32
    %c0_i32_1 = arith.constant 0 : i32
    return %c0_i32, %c0_i32_0 : i32, i32
  }
  func.func @transform_7(%arg0: i32) -> (i32, i32, i32) {
    %c0_i32 = arith.constant 0 : i32
    %c0_i32_0 = arith.constant 0 : i32
    %c0_i32_1 = arith.constant 0 : i32
    return %arg0, %c0_i32, %c0_i32_0 : i32, i32, i32
  }
  func.func @transform_8(%arg0: i32) -> (i32, i32, i32) {
    %c0_i32 = arith.constant 0 : i32
    %c0_i32_0 = arith.constant 0 : i32
    %c0_i32_1 = arith.constant 0 : i32
    return %arg0, %c0_i32, %c0_i32_0 : i32, i32, i32
  }
  func.func @transform_9(%arg0: i32) -> (i32, i32, i32) {
    %c0_i32 = arith.constant 0 : i32
    %c0_i32_0 = arith.constant 0 : i32
    %c0_i32_1 = arith.constant 0 : i32
    return %arg0, %c0_i32, %c0_i32_0 : i32, i32, i32
  }
  func.func @transform_10(%arg0: i32) -> (i32, i32, i32) {
    %c0_i32 = arith.constant 0 : i32
    %c0_i32_0 = arith.constant 0 : i32
    %c0_i32_1 = arith.constant 0 : i32
    return %arg0, %c0_i32, %c0_i32_0 : i32, i32, i32
  }
}

</mosaic_0001>

<bundles_post_ra>
// kernel: tpu_custom_call.1
= control target key start
LH: loop header
LB: loop body
LE: loop exit
PB: predicated region body
PF: predicated region fallthrough
CT: control target
= control target key end

     0   :  { %s4213_s0 = inlined_call_operand.hbm [shape: f32[2,48,128], index: 0, kind: input, shape index: {}]   ;;  %s4214_s1 = inlined_call_operand.hbm [shape: f32[2,80,128], index: 1, kind: input, shape index: {}]   ;;  %s4215_s2 = inlined_call_operand.vmem [shape: f32[128,128], index: 2, kind: input, shape index: {}]   ;;  %s4216_s3 = inlined_call_operand.hbm [shape: bf16[128,128], index: 3, kind: input, shape index: {}]   ;;  %s4217_s4 = inlined_call_operand.hbm [shape: f32[128,128], index: 4, kind: input, shape index: {}]   ;;  %s4218_s5 = inlined_call_operand.hbm [shape: f32[128,128], index: 5, kind: input, shape index: {}]   ;;  %s4219_s6 = inlined_call_operand.vmem [shape: f32[1,128], index: 6, kind: input, shape index: {}]   ;;  %s4220_s7 = inlined_call_operand.hbm [shape: bf16[2,48,80], index: 7, kind: input, shape index: {}]   ;;  %s4221_s8 = inlined_call_operand.vmem [shape: bf16[2,80,48], index: 8, kind: input, shape index: {}]   ;;  %s4222_s9 = inlined_call_operand.vmem [shape: f32[2,8,48], index: 9, kind: input, shape index: {}]   ;;  %s4223_s10 = inlined_call_operand.hbm [shape: f32[2,8,128], index: 10, kind: output, shape index: {}]  }
   0x1   :  { %4245 = sst [smem:[#allocation29_spill]] %s4213_s0 }
   0x2   :  { %4246 = sst [smem:[#allocation30_spill]] %s4216_s3 }
   0x3   :  { %4247 = sst [smem:[#allocation31_spill]] %s4222_s9 }
   0x4   :  { %4248 = sst [smem:[#allocation32_spill]] %s4223_s10 }
   0x5   :  { %15 = vsyncpa [#allocation3], 0 }
   0x6   :  { %17 = vsyncpa [#allocation3 + $0x1], 0 }
   0x7   :  { %18 = vsyncpa [#allocation6], 0 }
   0x8   :  { %20 = vsyncpa [#allocation6 + $0x1], 0 }
   0x9   :  { %21 = vsyncpa [#allocation9], 0 }
   0xa   :  { %22 = vsyncpa [#allocation12], 0 }
   0xb   :  { %24 = vsyncpa [#allocation12 + $0x1], 0 }
   0xc   :  { %25 = vsyncpa [#allocation4], 0 }
   0xd   :  { %27 = vsyncpa [#allocation4 + $0x1], 0  ;;  %s3119_s13 = smov 0   ;;  %s3121_s14 = smov 0  }
   0xe   :  { %s3123_s15 = smov 0   ;;  %s3125_s16 = smov 0  }
   0xf LB: > { %4249 = sst [smem:[#allocation20_spill]] %s3036_s13  ;;  %s3140_s17 = sadd.s32 4294967295, %s3048_s16   ;;  %s3048_s16 = sphi %s3125_s16, %s4328_s16   ;;  %s3044_s15 = sphi %s3123_s15, %s4332_s15   ;;  %s3040_s14 = sphi %s3121_s14, %s4331_s14   ;;  %s3036_s13 = sphi %s3119_s13, %s4330_s13  }
  0x10   : > { %s2027_s18 = sadd.s32 4294967294, %s3048_s16   ;;  %s3144_s19 = sadd.s32 1, %s3048_s16  }
  0x11   : > { %4250 = sst [smem:[#allocation21_spill]] %s3144_s19  ;;  %s40_s20 = sadd.s32 1, %s3044_s15 }
  0x12   : > { %s37_s21 = ssub.s32 %s3048_s16, %s3144_s19  ;;  %p47_p0 = scmp.ne.s32.totalorder %s3044_s15, %s3040_s14 }
  0x13   : > { %p38_p1 = scmp.eq.s32.totalorder %s37_s21, 0  ;;  %p48_p2 = scmp.eq.s32.totalorder %s3048_s16, 0 }
  0x14   : > { %p53_p3 = scmp.ne.s32.totalorder %s3040_s14, %s3036_s13  ;;  %p4228_p4 = scmp.eq.s32.totalorder %s3140_s17, 0 }
  0x15   : > { %s3156_s22 = scalar_select %p38_p1, %s3044_s15, %s40_s20  }
  0x16   : > { %p3158_p5 = por %p48_p2, %p47_p0  ;;  %p3164_p6 = por %p4228_p4, %p53_p3 }
  0x17   : > { %4251 = sst [smem:[#allocation22_spill]] %s3156_s22  ;;  %p286_p7 = scmp.eq.s32.totalorder %s3140_s17, 1 }
  0x18   : > { %s4252_s23 = scalar_select %p3158_p5, 1, 0 }
  0x19   : > { %s4253_s24 = scalar_select %p3164_p6, 1, 0 }
  0x1a   : > { %p292_p8 = scmp.eq.s32.totalorder %s2027_s18, 1  ;;  %p2028_p9 = scmp.ge.s32.totalorder %s3048_s16, 1 }
  0x1b   : > { %p299_p10 = scmp.lt.s32.totalorder %s3048_s16, 3  ;;  %p3171_p11 = por %p286_p7, %p47_p0 }
  0x1c   : > { %p3175_p12 = por %p292_p8, %p53_p3  ;;  %s3050_s28 = smov [#allocation7]  }
  0x1d   : > { %s4254_s25 = scalar_select %p3171_p11, 1, 0 }
  0x1e   : > { %s4256_s26 = scalar_select %p3175_p12, 1, 0 }
  0x1f   : > { %4255 = sst [smem:[#allocation23_spill]] %s4254_s25  ;;  %p3179_p13 = pnand %p2028_p9, %p299_p10 }
  0x20   : > { %4257 = sst [smem:[#allocation24_spill]] %s4256_s26  ;;  %s314_s29 = sshll.u32 %s3050_s28, 4  ;;  %s315_s29 = int_to_ptr.vmem [resolvable:$true] %s314_s29 }
  0x21   : > { %s4258_s27 = scalar_select %p3179_p13, 1, 0 }
  0x22   : > { %p2702_p1 = pneg %p3179_p13  ;;  %s3051_s11 = smov [#allocation8]  }
  0x23   : > { %s327_s12 = sshll.u32 %s3051_s11, 4  ;;  %s4260_s3 = sld [smem:[#allocation30_spill]]  ;;  %s328_s12 = int_to_ptr.vmem [resolvable:$true] %s327_s12 }
  0x24   : > { %p3187_p2 = pnand %p2702_p1, %p4228_p4 }
  0x26   : > { %p3200_p7 = pneg %p3187_p2 }
  0x29   : > { %s2792_s21 = scalar_lea.hbm %s4260_s3, 1024 }
  0x2a   : > { %p2793_p3 = scmp.ne.s32.totalorder %s4260_s3, %s2792_s21  ;;  %p2799_p10 = scmp.lt.u32.totalorder %s2792_s21, %s4260_s3 }
  0x2c   : > { %p2795_p8 = pnand %p3200_p7, %p2793_p3 }
  0x2e   : > { %p2796_p9 = pneg %p2795_p8 }
  0x30   : > { %p2801_p1 = pnand %p2799_p10, %p2796_p9 }
  0x32   : > { %2804 = shalt.err (!%p2801_p1)
}
  0x33   : > { %s2805_s11 = scalar_lea.vmem %s315_s29, 1024  ;;  %p2813_p11 = scmp.lt.s32.totalorder %s315_s29, %s315_s29 }
  0x34   : > { %p2806_p0 = scmp.ne.s32.totalorder %s315_s29, %s2805_s11  ;;  %p2814_p6 = scmp.lt.s32.totalorder %s2805_s11, %s2805_s11 }
  0x36   : > { %p2808_p4 = pnand %p2806_p0, %p3200_p7  ;;  %p2815_p13 = por %p2814_p6, %p2813_p11 }
  0x38   : > { %p2809_p12 = pneg %p2808_p4 }
  0x3a   : > { %p2816_p5 = pnand %p2815_p13, %p2809_p12 }
  0x3c   : > { %2819 = shalt.err (!%p2816_p5)
}
  0x3d   : > { %s4235_s19 = smov 64   ;;  %s4236_s22 = smov 4  }
  0x3e   : > { %2705 = dma.hbm_to_vmem [thread:$0]  (!%p3187_p2), %s4260_s3, 1024, %s315_s29, [#allocation6], %s4235_s19, %s4235_s19, %s4236_s22  }
  0x3f   : > { %s2820_s21 = scalar_lea.hbm %s4217_s4, 2048 }
  0x40   : > { %p2821_p4 = scmp.ne.s32.totalorder %s4217_s4, %s2820_s21  ;;  %p2827_p11 = scmp.lt.u32.totalorder %s2820_s21, %s4217_s4 }
  0x42   : > { %p2823_p5 = pnand %p2821_p4, %p3200_p7 }
  0x44   : > { %p2824_p6 = pneg %p2823_p5 }
  0x46   : > { %p2829_p12 = pnand %p2827_p11, %p2824_p6 }
  0x48   : > { %2832 = shalt.err (!%p2829_p12)
}
  0x49   : > { %s2833_s13 = scalar_lea.vmem %s328_s12, 2048  ;;  %p2841_p8 = scmp.lt.s32.totalorder %s328_s12, %s328_s12 }
  0x4a   : > { %p2834_p13 = scmp.ne.s32.totalorder %s328_s12, %s2833_s13  ;;  %p2842_p9 = scmp.lt.s32.totalorder %s2833_s13, %s2833_s13 }
  0x4c   : > { %p2836_p0 = pnand %p2834_p13, %p3200_p7  ;;  %p2843_p10 = por %p2842_p9, %p2841_p8 }
  0x4e   : > { %p2837_p3 = pneg %p2836_p0 }
  0x50   : > { %p2844_p1 = pnand %p2843_p10, %p2837_p3 }
  0x52   : > { %2847 = shalt.err (!%p2844_p1)
}
  0x53   : > { %s3054_s10 = smov 128   ;;  %s3055_s9 = smov 8  }
  0x54   : > { %2708 = dma.hbm_to_vmem [thread:$0]  (!%p3187_p2), %s4217_s4, 2048, %s328_s12, [#allocation9], %s3054_s10, %s3054_s10, %s3055_s9  }
  0x55   : > { %s3056_s26 = smov [#allocation10]   ;;  %s3242_s20 = sand.u32 1, %s3044_s15  }
  0x56   : > { %s340_s18 = sshll.u32 %s3056_s26, 4  ;;  %s2848_s13 = scalar_lea.hbm %s4218_s5, 2048  ;;  %s341_s18 = int_to_ptr.vmem [resolvable:$true] %s340_s18 }
  0x57   : > { %p2849_p5 = scmp.ne.s32.totalorder %s4218_s5, %s2848_s13  ;;  %p2855_p12 = scmp.lt.u32.totalorder %s2848_s13, %s4218_s5 }
  0x59   : > { %p2851_p6 = pnand %p2849_p5, %p3200_p7 }
  0x5b   : > { %p2852_p11 = pneg %p2851_p6 }
  0x5d   : > { %p2857_p13 = pnand %p2855_p12, %p2852_p11 }
  0x5f   : > { %2860 = shalt.err (!%p2857_p13)
}
  0x60   : > { %s2861_s12 = scalar_lea.vmem %s341_s18, 2048  ;;  %p2869_p9 = scmp.lt.s32.totalorder %s341_s18, %s341_s18 }
  0x61   : > { %p2862_p0 = scmp.ne.s32.totalorder %s341_s18, %s2861_s12  ;;  %p2870_p10 = scmp.lt.s32.totalorder %s2861_s12, %s2861_s12 }
  0x63   : > { %p2864_p3 = pnand %p2862_p0, %p3200_p7  ;;  %p2871_p1 = por %p2870_p10, %p2869_p9 }
  0x65   : > { %p2865_p8 = pneg %p2864_p3 }
  0x67   : > { %p2872_p4 = pnand %p2871_p1, %p2865_p8 }
  0x69   : > { %2875 = shalt.err (!%p2872_p4)
}
  0x6a   : > { %2711 = dma.hbm_to_vmem [thread:$0]  (!%p3187_p2), %s4218_s5, 2048, %s341_s18, [#allocation9], %s3054_s10, %s3054_s10, %s3055_s9  }
  0x6b   : > { %s2672_s28 = smul.u32 48, %s3242_s20  ;;  %p4262_p7 = scmp.ne.s32.totalorder %s4252_s23, 0 }
  0x6c   : > { %p4263_p5 = scmp.lt.s32.totalorder %s3048_s16, 2  ;;  %s2673_s30 = smul.u32 768, %s3048_s16 }
  0x6d   : > { %s378_s29 = sand.u32 1, %s3048_s16   ;;  %s4265_s0 = sld [smem:[#allocation29_spill]] }
  0x6e   : > { %p3270_p6 = pnand %p4263_p5, %p4262_p7  ;;  %s361_s18 = scalar_lea.vmem [#allocation2], %s2672_s28 }
  0x6f   : > { %s368_s13 = sshll.u32 %s361_s18, 4  ;;  %s358_s23 = scalar_lea.sflag [#allocation3], %s3242_s20  ;;  %s3281_s13 = int_to_ptr.vmem [resolvable:$true] %s368_s13 }
  0x70   : > { %p3288_p4 = pneg %p3270_p6 }
  0x73   : > { %s3279_s11 = scalar_lea.hbm %s4265_s0, %s2673_s30  ;;  %s2881_s30 = scalar_lea.hbm %s4265_s0, 1536 }
  0x74   : > { %s2876_s25 = scalar_lea.hbm %s3279_s11, 768  ;;  %p2882_p13 = scmp.lt.u32.totalorder %s3279_s11, %s4265_s0 }
  0x75   : > { %p2877_p2 = scmp.ne.s32.totalorder %s3279_s11, %s2876_s25  ;;  %p2883_p0 = scmp.lt.u32.totalorder %s2881_s30, %s2876_s25 }
  0x76   : > { %p2885_p8 = scmp.lt.u32.totalorder %s2876_s25, %s3279_s11 }
  0x77   : > { %p2879_p11 = pnand %p3288_p4, %p2877_p2  ;;  %p2884_p3 = por %p2883_p0, %p2882_p13 }
  0x79   : > { %p2880_p12 = pneg %p2879_p11  ;;  %p2886_p9 = por %p2885_p8, %p2884_p3 }
  0x7b   : > { %p2887_p10 = pnand %p2886_p9, %p2880_p12 }
  0x7d   : > { %2890 = shalt.err (!%p2887_p10)
}
  0x7e   : > { %s2891_s21 = scalar_lea.vmem %s3281_s13, 768  ;;  %s3057_s18 = smov [#allocation2]  }
  0x7f   : > { %p2892_p1 = scmp.ne.s32.totalorder %s3281_s13, %s2891_s21  ;;  %s2896_s3 = sshll.u32 %s3057_s18, 4  ;;  %s2897_s3 = int_to_ptr.vmem [resolvable:$false] %s2896_s3 }
  0x80   : > { %s2898_s19 = scalar_lea.vmem %s2897_s3, 1536  ;;  %p2899_p2 = scmp.lt.s32.totalorder %s3281_s13, %s2897_s3 }
  0x81   : > { %p2894_p7 = pnand %p2892_p1, %p3288_p4  ;;  %p2900_p11 = scmp.lt.s32.totalorder %s2898_s19, %s2891_s21 }
  0x83   : > { %p2895_p5 = pneg %p2894_p7  ;;  %p2901_p13 = por %p2900_p11, %p2899_p2 }
  0x85   : > { %p2902_p0 = pnand %p2901_p13, %p2895_p5 }
  0x87   : > { %2905 = shalt.err (!%p2902_p0)
}
  0x88   : > { %2715 = dma.hbm_to_vmem [thread:$0]  (!%p3270_p6), %s3279_s11, 768, %s3281_s13, %s358_s23, %s3054_s10, %s3054_s10, %s3055_s9  }
  0x89   : > { %s2674_s25 = smul.u32 80, %s3242_s20  ;;  %s3328_s0 = scalar_lea.sflag [#allocation6], %s378_s29 }
  0x8a   : > { %s2675_s30 = smul.u32 1280, %s3048_s16 }
  0x8b   : > { %s2676_s28 = smul.u32 24, %s3242_s20  ;;  %s382_s3 = scalar_lea.vmem [#allocation5], %s2674_s25 }
  0x8c   : > { %s3322_s18 = scalar_lea.hbm %s4214_s1, %s2675_s30  ;;  %s389_s19 = sshll.u32 %s382_s3, 4  ;;  %s3324_s19 = int_to_ptr.vmem [resolvable:$true] %s389_s19 }
  0x8d   : > { %s2906_s11 = scalar_lea.hbm %s3322_s18, 1280  ;;  %s2911_s30 = scalar_lea.hbm %s4214_s1, 2560 }
  0x8e   : > { %p2907_p12 = scmp.ne.s32.totalorder %s3322_s18, %s2906_s11  ;;  %p2912_p9 = scmp.lt.u32.totalorder %s3322_s18, %s4214_s1 }
  0x8f   : > { %p2913_p10 = scmp.lt.u32.totalorder %s2911_s30, %s2906_s11  ;;  %p2915_p7 = scmp.lt.u32.totalorder %s2906_s11, %s3322_s18 }
  0x90   : > { %p2909_p3 = pnand %p2907_p12, %p3288_p4 }
  0x91   : > { %p2914_p1 = por %p2913_p10, %p2912_p9 }
  0x92   : > { %p2910_p8 = pneg %p2909_p3 }
  0x93   : > { %p2916_p5 = por %p2915_p7, %p2914_p1 }
  0x95   : > { %p2917_p2 = pnand %p2916_p5, %p2910_p8 }
  0x97   : > { %2920 = shalt.err (!%p2917_p2)
}
  0x98   : > { %s2921_s29 = scalar_lea.vmem %s3324_s19, 1280  ;;  %s3058_s25 = smov [#allocation5]  }
  0x99   : > { %p2922_p11 = scmp.ne.s32.totalorder %s3324_s19, %s2921_s29  ;;  %s2926_s3 = sshll.u32 %s3058_s25, 4  ;;  %s2927_s3 = int_to_ptr.vmem [resolvable:$false] %s2926_s3 }
  0x9a   : > { %s2928_s13 = scalar_lea.vmem %s2927_s3, 2560  ;;  %p2929_p12 = scmp.lt.s32.totalorder %s3324_s19, %s2927_s3 }
  0x9b   : > { %p2924_p13 = pnand %p2922_p11, %p3288_p4  ;;  %p2930_p3 = scmp.lt.s32.totalorder %s2928_s13, %s2921_s29 }
  0x9d   : > { %p2925_p0 = pneg %p2924_p13  ;;  %p2931_p9 = por %p2930_p3, %p2929_p12 }
  0x9f   : > { %p2932_p10 = pnand %p2931_p9, %p2925_p0 }
  0xa1   : > { %2935 = shalt.err (!%p2932_p10)
}
  0xa2   : > { %2718 = dma.hbm_to_vmem [thread:$0]  (!%p3270_p6), %s3322_s18, 1280, %s3324_s19, %s3328_s0, %s3054_s10, %s3054_s10, %s3055_s9  }
  0xa3   : > { %s2677_s11 = smul.u32 384, %s3048_s16  ;;  %s403_s23 = scalar_lea.vmem [#allocation11], %s2676_s28 }
  0xa4   : > { %s410_s30 = sshll.u32 %s403_s23, 4  ;;  %s400_s25 = scalar_lea.sflag [#allocation12], %s3242_s20  ;;  %s3358_s30 = int_to_ptr.vmem [resolvable:$true] %s410_s30 }
  0xa5   : > { %s3363_s29 = scalar_lea.hbm %s4220_s7, %s2677_s11  ;;  %s2941_s9 = scalar_lea.hbm %s4220_s7, 768 }
  0xa6   : > { %s2936_s3 = scalar_lea.hbm %s3363_s29, 384  ;;  %p2942_p5 = scmp.lt.u32.totalorder %s3363_s29, %s4220_s7 }
  0xa7   : > { %p2937_p8 = scmp.ne.s32.totalorder %s3363_s29, %s2936_s3  ;;  %p2943_p2 = scmp.lt.u32.totalorder %s2941_s9, %s2936_s3 }
  0xa8   : > { %p2945_p13 = scmp.lt.u32.totalorder %s2936_s3, %s3363_s29 }
  0xa9   : > { %p2939_p1 = pnand %p2937_p8, %p3288_p4  ;;  %p2944_p11 = por %p2943_p2, %p2942_p5 }
  0xab   : > { %p2940_p7 = pneg %p2939_p1  ;;  %p2946_p0 = por %p2945_p13, %p2944_p11 }
  0xad   : > { %p2947_p12 = pnand %p2946_p0, %p2940_p7 }
  0xaf   : > { %2950 = shalt.err (!%p2947_p12)
}
  0xb0   : > { %s2951_s19 = scalar_lea.vmem %s3358_s30, 384  ;;  %s3059_s13 = smov [#allocation11]  }
  0xb1   : > { %p2952_p3 = scmp.ne.s32.totalorder %s3358_s30, %s2951_s19  ;;  %s2956_s11 = sshll.u32 %s3059_s13, 4  ;;  %s2957_s11 = int_to_ptr.vmem [resolvable:$false] %s2956_s11 }
  0xb2   : > { %s2958_s23 = scalar_lea.vmem %s2957_s11, 768  ;;  %p2959_p8 = scmp.lt.s32.totalorder %s3358_s30, %s2957_s11 }
  0xb3   : > { %p2954_p9 = pnand %p2952_p3, %p3288_p4  ;;  %p2960_p1 = scmp.lt.s32.totalorder %s2958_s23, %s2951_s19 }
  0xb5   : > { %p2955_p10 = pneg %p2954_p9  ;;  %p2961_p5 = por %p2960_p1, %p2959_p8 }
  0xb7   : > { %p2962_p2 = pnand %p2961_p5, %p2955_p10 }
  0xb9   : > { %2965 = shalt.err (!%p2962_p2)
}
  0xba   : > { %s4267_s26 = smov 4   ;;  %s4268_s21 = smov 64  }
  0xbb   : > { %2721 = dma.hbm_to_vmem [thread:$0]  (!%p3270_p6), %s3363_s29, 384, %s3358_s30, %s400_s25, %s4268_s21, %s4268_s21, %s4267_s26  }
  0xbc   : > { %p4269_p4 = scmp.ne.s32.totalorder %s4258_s27, 0 }
  0xbe   : > { %437 = sbr.rel (%p4269_p4) target bundleno = 2605 (0xa2d), region = 60 }
  0xc5   : > { %s3395_s12 = sand.u32 1, %s3040_s14   ;;  %p4270_p7 = scmp.ne.s32.totalorder %s4253_s24, 0 }
  0xc6   : > { %s2678_s3 = smul.u32 48, %s3395_s12  ;;  %s440_s0 = scalar_lea.sflag [#allocation3], %s3395_s12 }
  0xc8   : > { %s3399_s22 = scalar_lea.vmem [#allocation2], %s2678_s3 }
  0xc9   : > { %3011 = dma.done.wait (%p4270_p7), %s440_s0, 768  }
  0xca   : > { %3013 = vsyncadd (%p4270_p7), %s440_s0, 4294966528  ;;  %s448_s27 = sand.u32 1, %s3140_s17   ;;  %s2679_s20 = smul.u32 80, %s3395_s12 }
  0xcb   : > { %s449_s30 = scalar_lea.sflag [#allocation6], %s448_s27 }
  0xcc   : > { %s3407_s29 = scalar_lea.vmem [#allocation5], %s2679_s20 }
  0xcd   : > { %3015 = dma.done.wait (%p4270_p7), %s449_s30, 1280  }
  0xce   : > { %3017 = vsyncadd (%p4270_p7), %s449_s30, 4294966016  ;;  %p4271_p6 = scmp.eq.s32.totalorder %s3140_s17, 0 }
  0xd0   : > { %3019 = dma.done.wait (%p4271_p6), [#allocation6], 1024   ;;  %p4272_p11 = pmov %p4271_p6 }
  0xd1   : > { %p4273_p13 = pmov %p4271_p6 }
  0xd2   : > { %3021 = vsyncadd (%p4272_p11), [#allocation6], 4294966272 }
  0xd3   : > { %3023 = dma.done.wait (%p4273_p13), [#allocation9], 4096   ;;  %p4274_p0 = pmov %p4271_p6 }
  0xd4   : > { %s2680_s25 = smul.u32 24, %s3395_s12  ;;  %s470_s10 = scalar_lea.sflag [#allocation12], %s3395_s12 }
  0xd5   : > { %3025 = vsyncadd (%p4274_p0), [#allocation9], 4294963200 }
  0xd6   : > { %s3423_s9 = scalar_lea.vmem [#allocation11], %s2680_s25 }
  0xd7   : > { %3027 = dma.done.wait (%p4270_p7), %s470_s10, 384  }
  0xd8   : > { %3029 = vsyncadd (%p4270_p7), %s470_s10, 4294966912  ;;  %v581_v0 = vld [vmem:[%s4215_s2] sm:$0xff]  ;;  %v582_v1 = vld [vmem:[%s4215_s2 + $0x8] sm:$0xff]  ;;  %v4243_v34 = vmov 0.0   ;;  %vm3061_vm0 = vmmov 0   ;;  %v722_v35 = vlaneseq  ;;  %vm773_vm12 = vcmask 654336  }
  0xd9   : > { %v583_v2 = vld [vmem:[%s4215_s2 + $0x10] sm:$0xff]  ;;  %v2561_v3 = vpack.c.bf16 %v582_v1, %v581_v0  ;;  %v584_v4 = vld [vmem:[%s4215_s2 + $0x18] sm:$0xff]  ;;  %v585_v6 = vld [vmem:[%s4215_s2 + $0x20] sm:$0xff]  ;;  %2296 = vmatprep.subr.bf16.mxu1 %v4243_v34  ;;  %2302 = vmatprep.mubr.msk.bf16.mxu1 %vm3061_vm0, %v4243_v34  ;;  %p529_p12 = scmp.lt.s32.totalorder %s3140_s17, 1  ;;  %vm920_vm14 = vcmask 392192   ;;  %s4320_s21 = sld [smem:[#allocation31_spill]] }
  0xda   : > { %v2565_v5 = vpack.c.bf16 %v584_v4, %v583_v2  ;;  %v586_v7 = vld [vmem:[%s4215_s2 + $0x28] sm:$0xff]  ;;  %v571_v9 = vld [vmem:[%s3407_s29] sm:$0xff]  ;;  %v588_v11 = vld [vmem:[%s4215_s2 + $0x38] sm:$0xff]  ;;  %v3493_v36 = vshrl.u32 %v722_v35, 7  ;;  %s4321_s3 = sld [smem:[#allocation23_spill]]  ;;  %s2040_s0 = sshll.u32 %s3395_s12, 3 }
  0xdb   : > { %2562 = vmatprep.subr.bf16.mxu0 %v2561_v3  ;;  %v2569_v8 = vpack.c.bf16 %v586_v7, %v585_v6  ;;  %v587_v10 = vld [vmem:[%s4215_s2 + $0x30] sm:$0xff]  ;;  %2259 = vmatprep.mubr.f32.mxu0 %v571_v9  ;;  %v589_v12 = vld [vmem:[%s4215_s2 + $0x40] sm:$0xff]  ;;  %v590_v13 = vld [vmem:[%s4215_s2 + $0x48] sm:$0xff]  ;;  %s528_s27 = scalar_lea.vmem [#allocation13], %s2040_s0  ;;  %s2081_s30 = sshll.u32 %s3140_s17, 7 }
  0xdc   : > { %2564 = vmatpush3.bf16.msra.mxu0 %v2561_v3  ;;  %v2573_v14 = vpack.c.bf16 %v588_v11, %v587_v10  ;;  %v591_v15 = vld [vmem:[%s4215_s2 + $0x50] sm:$0xff]  ;;  %v592_v16 = vld [vmem:[%s4215_s2 + $0x58] sm:$0xff]  ;;  %v2577_v17 = vpack.c.bf16 %v590_v13, %v589_v12  ;;  %v593_v19 = vld [vmem:[%s4215_s2 + $0x60] sm:$0xff]  ;;  %v724_v37 = vadd.s32 8, %v3493_v36  ;;  %v725_v38 = vadd.s32 16, %v3493_v36  ;;  %s1859_s20 = sshll.u32 %s528_s27, 4  ;;  %s4166_s20 = int_to_ptr.vmem [resolvable:$true] %s1859_s20 }
  0xdd   : > { %2566 = vmatprep.subr.bf16.mxu0 %v2565_v5  ;;  %v2581_v18 = vpack.c.bf16 %v592_v16, %v591_v15  ;;  %v594_v20 = vld [vmem:[%s4215_s2 + $0x68] sm:$0xff]  ;;  %v595_v22 = vld [vmem:[%s4215_s2 + $0x70] sm:$0xff]  ;;  %v596_v23 = vld [vmem:[%s4215_s2 + $0x78] sm:$0xff]  ;;  %v726_v39 = vadd.s32 24, %v3493_v36  ;;  %v727_v40 = vadd.s32 32, %v3493_v36  ;;  %v728_v42 = vadd.s32 40, %v3493_v36 }
  0xde   : > { %v2585_v21 = vpack.c.bf16 %v594_v20, %v593_v19  ;;  %v2589_v24 = vpack.c.bf16 %v596_v23, %v595_v22  ;;  %v572_v25 = vld [vmem:[%s3407_s29 + $0x8] sm:$0xff]  ;;  %v573_v26 = vld [vmem:[%s3407_s29 + $0x10] sm:$0xff]  ;;  %v574_v27 = vld [vmem:[%s3407_s29 + $0x18] sm:$0xff]  ;;  %v734_v45 = vand.u32 1, %v724_v37  ;;  %v729_v46 = vadd.s32 48, %v3493_v36  ;;  %s1846_s18 = scalar_lea.sflag [#allocation4], %s3395_s12 }
  0xdf   : > { %v575_v28 = vld [vmem:[%s3407_s29 + $0x20] sm:$0xff]  ;;  %v576_v29 = vld [vmem:[%s3407_s29 + $0x28] sm:$0xff]  ;;  %v577_v30 = vld [vmem:[%s3407_s29 + $0x30] sm:$0xff]  ;;  %vm850_vm1 = vcmp.lt.s32.totalorder %v3493_v36, 7  ;;  %vm871_vm2 = vcmp.lt.s32.totalorder %v3493_v36, 1  ;;  %v735_v48 = vand.u32 1, %v725_v38 }
  0xe0   : > { %2568 = vmatpush3.bf16.msra.mxu0 %v2565_v5  ;;  %v578_v31 = vld [vmem:[%s3407_s29 + $0x38] sm:$0xff]  ;;  %v579_v32 = vld [vmem:[%s3407_s29 + $0x40] sm:$0xff]  ;;  %v580_v33 = vld [vmem:[%s3407_s29 + $0x48] sm:$0xff]  ;;  %v736_v51 = vand.u32 1, %v726_v39  ;;  %v737_v52 = vand.u32 1, %v727_v40  ;;  %v738_v57 = vand.u32 1, %v728_v42 }
  0xe1   : > { %2570 = vmatprep.subr.bf16.mxu0 %v2569_v8  ;;  %vm3519_vm3 = vcmp.eq.s32.totalorder %v734_v45, 0  ;;  %v739_v61 = vand.u32 1, %v729_v46  ;;  %vm3536_vm4 = vcmp.eq.s32.totalorder %v735_v48, 0  ;;  %v733_v3 = vand.u32 1, %v3493_v36  ;;  %s3738_s29 = scalar_select %p529_p12, %s3140_s17, 1 }
  0xe2   : > { %vm3542_vm5 = vcmp.eq.s32.totalorder %v736_v51, 0  ;;  %vm3546_vm6 = vcmp.eq.s32.totalorder %v737_v52, 0  ;;  %vm3552_vm7 = vcmp.eq.s32.totalorder %v738_v57, 0  ;;  %v730_v15 = vadd.s32 56, %v3493_v36  ;;  %s2966_s19 = scalar_lea.vmem %s4166_s20, 128  ;;  %p4323_p9 = scmp.ne.s32.totalorder %s4321_s3, 0 }
  0xe3   : > { %vm3559_vm8 = vcmp.eq.s32.totalorder %v739_v61, 0  ;;  %v731_v16 = vadd.s32 64, %v3493_v36  ;;  %vm3579_vm9 = vcmp.eq.s32.totalorder %v733_v3, 0  ;;  %v732_v37 = vadd.s32 72, %v3493_v36  ;;  %s2681_s28 = smul.u32 40, %s3738_s29  ;;  %p2967_p3 = scmp.ne.s32.totalorder %s4166_s20, %s2966_s19 }
  0xe4   : > { %2572 = vmatpush3.bf16.msra.mxu0 %v2569_v8  ;;  %s3063_s17 = smov [#allocation13]  }
  0xe5   : > { %2574 = vmatprep.subr.bf16.mxu0 %v2573_v14  ;;  %v741_v35 = vand.u32 1, %v731_v16  ;;  %s3744_s13 = scalar_lea.vmem %s4221_s8, %s2681_s28  ;;  %p2968_p10 = pnand %p2967_p3, %p4323_p9 }
  0xe7   : > { %vm3636_vm11 = vcmp.eq.s32.totalorder %v741_v35, 0  ;;  %p2969_p8 = pneg %p2968_p10 }
  0xe8   : > { %2576 = vmatpush3.bf16.msra.mxu0 %v2573_v14 }
  0xe9   : > { %2578 = vmatprep.subr.bf16.mxu0 %v2577_v17 }
  0xec   : > { %2580 = vmatpush3.bf16.msra.mxu0 %v2577_v17 }
  0xed   : > { %2582 = vmatprep.subr.bf16.mxu0 %v2581_v18 }
  0xf0   : > { %2584 = vmatpush3.bf16.msra.mxu0 %v2581_v18 }
  0xf1   : > { %2586 = vmatprep.subr.bf16.mxu0 %v2585_v21 }
  0xf4   : > { %2588 = vmatpush3.bf16.msra.mxu0 %v2585_v21 }
  0xf5   : > { %2590 = vmatprep.subr.bf16.mxu0 %v2589_v24 }
  0xf8   : > { %2592 = vmatpush3.bf16.msra.mxu0 %v2589_v24 }
  0xf9   : > { %2274 = vmatprep.subr.bf16.mxu0 %v4243_v34 }
  0xfb   : > { %2260 = vmatmul.mubr.f32.vlgmr.msra.gmra.mrb[0].mxu0 %v572_v25 }
  0xfc   : > { %2262 = vmatprep.mubr.f32.mxu0 %v573_v26 }
  0xff   : > { %2263 = vmatmul.mubr.f32.gmra.mrb[2].mxu0 %v574_v27 }
 0x100   : > { %2265 = vmatprep.mubr.f32.mxu0 %v575_v28 }
 0x103   : > { %2266 = vmatmul.mubr.f32.gmra.mrb[4].mxu0 %v576_v29 }
 0x104   : > { %2268 = vmatprep.mubr.f32.mxu0 %v577_v30 }
 0x107   : > { %2269 = vmatmul.mubr.f32.gmra.mrb[6].mxu0 %v578_v31 }
 0x108   : > { %2271 = vmatprep.mubr.f32.mxu0 %v579_v32 }
 0x10b   : > { %2272 = vmatmul.mubr.f32.gmra.mrb[8].mxu0 %v580_v33  ;;  %v740_v33 = vand.u32 1, %v730_v15 }
 0x10c   : > { %2284 = vmatprep.mubr.msk.bf16.mxu0 %vm3061_vm0, %v4243_v34 }
 0x10d   : > { %vm3632_vm10 = vcmp.eq.s32.totalorder %v740_v33, 0 }
 0x1ce   : > { %v3499_v41 = vpop.f32.mrb[0].mxu0 }
 0x1cf   : > { %v713_v43 = vmax.f32 %v3499_v41, 0.0  ;;  %v3503_v44 = vpop.f32.mrb[1].mxu0 }
 0x1d0   : > { %v3507_v47 = vmax.f32 %v3503_v44, 0.0 }
 0x1d1   : > { %v841_v49 = vrot.slane %v713_v43, 1  ;;  %v862_v50 = vrot.slane %v713_v43, 7 }
 0x1d2   : > { %v840_v53 = vrot.slane %v3507_v47, 1  ;;  %v861_v54 = vrot.slane %v3507_v47, 7  ;;  %v3513_v55 = vpop.f32.mrb[2].mxu0  ;;  %v753_v56 = vpack.c.bf16 %v713_v43, %v3507_v47 }
 0x1d3   : > { %v715_v58 = vmax.f32 %v3513_v55, 0.0  ;;  %v3517_v59 = vpop.f32.mrb[3].mxu0 }
 0x1d4   : > { %v714_v62 = vmax.f32 %v3517_v59, 0.0  ;;  %2275 = vmatpush3.bf16.msra.mxu0 %v753_v56  ;;  %v3528_v63 = vsel %vm850_vm1, %v840_v53, %v841_v49  ;;  %v3534_v0 = vsel %vm871_vm2, %v861_v54, %v862_v50 }
 0x1d5   : > { %v843_v2 = vrot.slane %v715_v58, 1  ;;  %2276 = vmatprep.subr.bf16.mxu0 %v4243_v34  ;;  %v864_v6 = vrot.slane %v715_v58, 7 }
 0x1d6   : > { %v842_v7 = vrot.slane %v714_v62, 1  ;;  %v863_v8 = vrot.slane %v714_v62, 7  ;;  %v3550_v9 = vpop.f32.mrb[4].mxu0  ;;  %v754_v10 = vpack.c.bf16 %v715_v58, %v714_v62  ;;  %v1548_v62 = vld [vmem:[#allocation10 + $0x18] sm:$0xff] }
 0x1d7   : > { %v717_v12 = vmax.f32 %v3550_v9, 0.0  ;;  %v3557_v13 = vpop.f32.mrb[5].mxu0 }
 0x1d8   : > { %v716_v17 = vmax.f32 %v3557_v13, 0.0  ;;  %2277 = vmatpush3.bf16.msra.mxu0 %v754_v10  ;;  %v3568_v18 = vsel %vm850_vm1, %v841_v49, %v842_v7  ;;  %v3572_v19 = vsel %vm850_vm1, %v842_v7, %v843_v2  ;;  %v3576_v20 = vsel %vm871_vm2, %v862_v50, %v863_v8 }
 0x1d9   : > { %v845_v21 = vrot.slane %v717_v12, 1  ;;  %v866_v22 = vrot.slane %v717_v12, 7  ;;  %2278 = vmatprep.subr.bf16.mxu0 %v4243_v34  ;;  %v3595_v30 = vsel %vm871_vm2, %v863_v8, %v864_v6 }
 0x1da   : > { %v844_v26 = vrot.slane %v716_v17, 1  ;;  %v865_v27 = vrot.slane %v716_v17, 7  ;;  %v3591_v28 = vpop.f32.mrb[6].mxu0  ;;  %v755_v29 = vpack.c.bf16 %v717_v12, %v716_v17 }
 0x1db   : > { %v719_v31 = vmax.f32 %v3591_v28, 0.0  ;;  %v3598_v32 = vpop.f32.mrb[7].mxu0 }
 0x1dc   : > { %v718_v38 = vmax.f32 %v3598_v32, 0.0  ;;  %2279 = vmatpush3.bf16.msra.mxu0 %v755_v29  ;;  %v3604_v39 = vsel %vm850_vm1, %v843_v2, %v844_v26  ;;  %v3608_v40 = vsel %vm850_vm1, %v844_v26, %v845_v21  ;;  %v3612_v42 = vsel %vm871_vm2, %v864_v6, %v865_v27 }
 0x1dd   : > { %v847_v43 = vrot.slane %v719_v31, 1  ;;  %v868_v45 = vrot.slane %v719_v31, 7  ;;  %2280 = vmatprep.subr.bf16.mxu0 %v4243_v34  ;;  %v3627_v56 = vsel %vm871_vm2, %v865_v27, %v866_v22  ;;  %v742_v2 = vand.u32 1, %v732_v37  ;;  %v3667_v27 = vld [vmem:[%s3423_s9] sm:$0xff]  }
 0x1de   : > { %v846_v49 = vrot.slane %v718_v38, 1  ;;  %v867_v50 = vrot.slane %v718_v38, 7  ;;  %v3623_v51 = vpop.f32.mrb[8].mxu0  ;;  %v756_v52 = vpack.c.bf16 %v719_v31, %v718_v38  ;;  %v1551_v31 = vld [vmem:[#allocation10 + $0x30] sm:$0xff] }
 0x1df   : > { %v721_v57 = vmax.f32 %v3623_v51, 0.0  ;;  %v3630_v58 = vpop.f32.mrb[9].mxu0  ;;  %vm3675_vm13 = vcmp.eq.s32.totalorder %v742_v2, 0  ;;  %v3753_v2 = vld [vmem:[#allocation7 + $0x10] sm:$0xff]  }
 0x1e0   : > { %v720_v3 = vmax.f32 %v3630_v58, 0.0  ;;  %2281 = vmatpush3.bf16.msra.mxu0 %v756_v52  ;;  %v3643_v6 = vsel %vm850_vm1, %v845_v21, %v846_v49  ;;  %v3647_v7 = vsel %vm850_vm1, %v846_v49, %v847_v43  ;;  %v3651_v8 = vsel %vm871_vm2, %v866_v22, %v867_v50  ;;  %v3723_v49 = vld [vmem:[%s3423_s9 + $0x8] sm:$0xff]  }
 0x1e1   : > { %v849_v10 = vrot.slane %v721_v57, 1  ;;  %v870_v12 = vrot.slane %v721_v57, 7  ;;  %2282 = vmatprep.subr.bf16.mxu0 %v4243_v34  ;;  %v3664_v22 = vsel %vm871_vm2, %v867_v50, %v868_v45  ;;  %v3730_v50 = vld [vmem:[%s3423_s9 + $0x10] sm:$0xff]   ;;  %v3746_v52 = vld [vmem:[#allocation7] sm:$0xff]  }
 0x1e2   : > { %v848_v17 = vrot.slane %v720_v3, 1  ;;  %v869_v21 = vrot.slane %v720_v3, 7  ;;  %v757_v26 = vpack.c.bf16 %v721_v57, %v720_v3  ;;  %v3749_v57 = vld [vmem:[#allocation7 + $0x8] sm:$0xff]   ;;  %v3757_v3 = vld [vmem:[#allocation7 + $0x18] sm:$0xff]  }
 0x1e3   : > { %v3673_v29 = vsel %vm871_vm2, %v870_v12, %v861_v54  ;;  %v3683_v33 = vsel %vm850_vm1, %v849_v10, %v840_v53 }
 0x1e4   : > { %2283 = vmatpush3.bf16.msra.mxu0 %v757_v26  ;;  %v882_v35 = vsel %vm3579_vm9, %v3528_v63, %v3673_v29  ;;  %v3691_v54 = vsel %vm850_vm1, %v847_v43, %v848_v17  ;;  %v3695_v37 = vsel %vm850_vm1, %v848_v17, %v849_v10  ;;  %v3699_v47 = vsel %vm871_vm2, %v868_v45, %v869_v21  ;;  %v3761_v10 = vld [vmem:[#allocation7 + $0x20] sm:$0xff]  }
 0x1e5   : > { %2322 = vmatprep.subr.bf16.mxu0 %v4243_v34  ;;  %v3712_v43 = vsel %vm871_vm2, %v869_v21, %v870_v12  ;;  %v3765_v12 = vld [vmem:[#allocation7 + $0x28] sm:$0xff]   ;;  %v4300_v63 = vsel %vm3536_vm4, %v3572_v19, %v3576_v20  ;;  %v4302_v19 = vsel %vm3546_vm6, %v3608_v40, %v3612_v42  ;;  %v4304_v40 = vsel %vm3559_vm8, %v3647_v7, %v3651_v8 }
 0x1e6   : > { %v4306_v7 = vsel %vm3636_vm11, %v3695_v37, %v3699_v47 }
 0x1e7   : > { %2285 = vmatmul.mubr.msk.bf16.vlgmr.msra.gmra.mrb[12].mxu0 %vm773_vm12, %v3667_v27 }
 0x1e8   : > { %2288 = vmatprep.mubr.msk.bf16.mxu0 %vm3061_vm0, %v4243_v34  ;;  %2323 = vmatpush3.bf16.msra.mxu0 %v3746_v52 }
 0x1e9   : > { %2324 = vmatprep.subr.bf16.mxu0 %v4243_v34 }
 0x1ec   : > { %2325 = vmatpush3.bf16.msra.mxu0 %v3749_v57 }
 0x1ed   : > { %2326 = vmatprep.subr.bf16.mxu0 %v4243_v34 }
 0x1ef   : > { %2289 = vmatmul.mubr.msk.bf16.gmra.mrb[16].mxu0 %vm773_vm12, %v3723_v49 }
 0x1f0   : > { %2292 = vmatprep.mubr.msk.bf16.mxu0 %vm3061_vm0, %v4243_v34  ;;  %2327 = vmatpush3.bf16.msra.mxu0 %v3753_v2 }
 0x1f1   : > { %2328 = vmatprep.subr.bf16.mxu0 %v4243_v34 }
 0x1f4   : > { %2329 = vmatpush3.bf16.msra.mxu0 %v3757_v3 }
 0x1f5   : > { %2330 = vmatprep.subr.bf16.mxu0 %v4243_v34 }
 0x1f7   : > { %2293 = vmatmul.mubr.msk.bf16.gmra.mrb[20].mxu0 %vm773_vm12, %v3730_v50 }
 0x1f8   : > { %2338 = vmatprep.mubr.msk.bf16.mxu0 %vm3061_vm0, %v4243_v34  ;;  %2331 = vmatpush3.bf16.msra.mxu0 %v3761_v10 }
 0x1f9   : > { %2332 = vmatprep.subr.bf16.mxu0 %v4243_v34 }
 0x1fc   : > { %2333 = vmatpush3.bf16.msra.mxu0 %v3765_v12 }
 0x1fd   : > { %2334 = vmatprep.subr.bf16.mxu0 %v4243_v34 }
 0x2ba   : > { %v817_v17 = vpop.f32.mrb[12].mxu0 }
 0x2bb   : > { %v2286_v21 = vpop.f32.mrb[13].mxu0 }
 0x2bc   : > { %v820_v26 = vpop.f32.mrb[14].mxu0 }
 0x2bd   : > { %v892_v45 = vpack.c.bf16 %v820_v26, %v817_v17  ;;  %v2287_v38 = vpop.f32.mrb[15].mxu0 }
 0x2be   : > { %v3773_v38 = vld [vmem:[%s3744_s13] sm:$0xff]  }
 0x2bf   : > { %2297 = vmatpush3.bf16.msra.mxu1 %v892_v45 }
 0x2c0   : > { %2298 = vmatprep.subr.bf16.mxu1 %v4243_v34 }
 0x2c2   : > { %v825_v53 = vpop.f32.mrb[16].mxu0 }
 0x2c3   : > { %v2290_v16 = vpop.f32.mrb[17].mxu0 }
 0x2c4   : > { %v828_v15 = vpop.f32.mrb[18].mxu0  ;;  %v3812_v16 = vld [vmem:[#allocation7 + $0x38] sm:$0xff]  }
 0x2c5   : > { %v893_v48 = vpack.c.bf16 %v828_v15, %v825_v53  ;;  %v2291_v46 = vpop.f32.mrb[19].mxu0  ;;  %v3808_v15 = vld [vmem:[#allocation7 + $0x30] sm:$0xff]  }
 0x2c6   : > { %v3781_v46 = vld [vmem:[%s3744_s13 + $0x8] sm:$0xff]   ;;  %2335 = vmatpush3.bf16.msra.mxu0 %v3808_v15 }
 0x2c7   : > { %2299 = vmatpush3.bf16.msra.mxu1 %v893_v48  ;;  %4295 = vst [vmem:[#allocation25_spill] sm:$0xff] %v3781_v46  ;;  %v3802_v48 = vld [vmem:[%s3744_s13 + $0x20] sm:$0xff]   ;;  %2336 = vmatprep.subr.bf16.mxu0 %v4243_v34 }
 0x2c8   : > { %2300 = vmatprep.subr.bf16.mxu1 %v4243_v34  ;;  %4298 = vst [vmem:[#allocation28_spill] sm:$0xff] %v3802_v48 }
 0x2ca   : > { %v833_v25 = vpop.f32.mrb[20].mxu0  ;;  %2337 = vmatpush3.bf16.msra.mxu0 %v3812_v16 }
 0x2cb   : > { %v2294_v24 = vpop.f32.mrb[21].mxu0  ;;  %2380 = vmatprep.subr.bf16.mxu0 %v4243_v34 }
 0x2cc   : > { %v836_v21 = vpop.f32.mrb[22].mxu0  ;;  %v3788_v24 = vld [vmem:[%s3744_s13 + $0x10] sm:$0xff]  }
 0x2cd   : > { %v894_v17 = vpack.c.bf16 %v836_v21, %v833_v25  ;;  %v2295_v26 = vpop.f32.mrb[23].mxu0  ;;  %4296 = vst [vmem:[#allocation26_spill] sm:$0xff] %v3788_v24  ;;  %v3795_v25 = vld [vmem:[%s3744_s13 + $0x18] sm:$0xff]   ;;  %s2970_s13 = sshll.u32 %s3063_s17, 4  ;;  %s2971_s13 = int_to_ptr.vmem [resolvable:$false] %s2970_s13 }
 0x2ce   : > { %4297 = vst [vmem:[#allocation27_spill] sm:$0xff] %v3795_v25  ;;  %v4299_v26 = vsel %vm3519_vm3, %v3568_v18, %v3534_v0  ;;  %v4301_v0 = vsel %vm3542_vm5, %v3604_v39, %v3595_v30  ;;  %v4303_v30 = vsel %vm3552_vm7, %v3643_v6, %v3627_v56  ;;  %v4305_v56 = vsel %vm3632_vm10, %v3691_v54, %v3664_v22  ;;  %s2972_s9 = scalar_lea.vmem %s2971_s13, 256  ;;  %p2973_p1 = scmp.lt.s32.totalorder %s4166_s20, %s2971_s13 }
 0x2cf   : > { %2301 = vmatpush3.bf16.msra.mxu1 %v894_v17  ;;  %v4307_v22 = vsel %vm3675_vm13, %v3683_v33, %v3712_v43  ;;  %p2974_p5 = scmp.lt.s32.totalorder %s2972_s9, %s2966_s19 }
 0x2d0   : > { %2358 = vmatprep.subr.bf16.mxu1 %v4243_v34 }
 0x2d1   : > { %p2975_p2 = por %p2974_p5, %p2973_p1 }
 0x2d2   : > { %2303 = vmatmul.mubr.msk.bf16.vlgmr.msra.gmra.mrb[0].mxu1 %vm920_vm14, %v3773_v38 }
 0x2d3   : > { %2306 = vmatprep.mubr.msk.bf16.mxu1 %vm3061_vm0, %v4243_v34  ;;  %p2976_p4 = pnand %p2975_p2, %p2969_p8 }
 0x2da   : > { %2307 = vmatmul.mubr.msk.bf16.gmra.mrb[4].mxu1 %vm920_vm14, %v3781_v46 }
 0x2db   : > { %2310 = vmatprep.mubr.msk.bf16.mxu1 %vm3061_vm0, %v4243_v34 }
 0x2e2   : > { %2311 = vmatmul.mubr.msk.bf16.gmra.mrb[8].mxu1 %vm920_vm14, %v3788_v24 }
 0x2e3   : > { %2314 = vmatprep.mubr.msk.bf16.mxu1 %vm3061_vm0, %v4243_v34 }
 0x2ea   : > { %2315 = vmatmul.mubr.msk.bf16.gmra.mrb[12].mxu1 %vm920_vm14, %v3795_v25 }
 0x2eb   : > { %2318 = vmatprep.mubr.msk.bf16.mxu1 %vm3061_vm0, %v4243_v34 }
 0x2f2   : > { %2319 = vmatmul.mubr.msk.bf16.gmra.mrb[16].mxu1 %vm920_vm14, %v3802_v48 }
 0x2f3   : > { %2368 = vmatprep.mubr.msk.bf16.mxu1 %vm3061_vm0, %v4243_v34 }
 0x3a5   : > { %v970_v53 = vpop.f32.mrb[0].mxu1 }
 0x3a6   : > { %v1009_v45 = vsub.f32 %v970_v53, %v882_v35  ;;  %v2304_v21 = vpop.f32.mrb[1].mxu1 }
 0x3a7   : > { %v973_v17 = vpop.f32.mrb[2].mxu1 }
 0x3a8   : > { %v1010_v48 = vsub.f32 %v973_v17, %v4299_v26  ;;  %v2305_v25 = vpop.f32.mrb[3].mxu1 }
 0x3aa   : > { %v1019_v24 = vpack.c.bf16 %v1010_v48, %v1009_v45 }
 0x3ac   : > { %2339 = vmatmul.mubr.bf16.vlgmr.msra.gmra.mrb[24].mxu0 %v1019_v24 }
 0x3ad   : > { %v978_v46 = vpop.f32.mrb[4].mxu1  ;;  %2342 = vmatprep.mubr.msk.bf16.mxu0 %vm3061_vm0, %v4243_v34 }
 0x3ae   : > { %v1011_v29 = vsub.f32 %v978_v46, %v4300_v63  ;;  %v2308_v35 = vpop.f32.mrb[5].mxu1 }
 0x3af   : > { %v981_v53 = vpop.f32.mrb[6].mxu1 }
 0x3b0   : > { %v1012_v18 = vsub.f32 %v981_v53, %v4301_v0  ;;  %v2309_v25 = vpop.f32.mrb[7].mxu1 }
 0x3b2   : > { %v1020_v24 = vpack.c.bf16 %v1012_v18, %v1011_v29 }
 0x3b4   : > { %2343 = vmatmul.mubr.bf16.gmra.mrb[28].mxu0 %v1020_v24 }
 0x3b5   : > { %v986_v48 = vpop.f32.mrb[8].mxu1  ;;  %2346 = vmatprep.mubr.msk.bf16.mxu0 %vm3061_vm0, %v4243_v34 }
 0x3b6   : > { %v1013_v20 = vsub.f32 %v986_v48, %v4302_v19  ;;  %v2312_v46 = vpop.f32.mrb[9].mxu1 }
 0x3b7   : > { %v989_v45 = vpop.f32.mrb[10].mxu1 }
 0x3b8   : > { %v1014_v39 = vsub.f32 %v989_v45, %v4303_v30  ;;  %v2313_v21 = vpop.f32.mrb[11].mxu1 }
 0x3ba   : > { %v1021_v17 = vpack.c.bf16 %v1014_v39, %v1013_v20 }
 0x3bc   : > { %2347 = vmatmul.mubr.bf16.gmra.mrb[32].mxu0 %v1021_v17 }
 0x3bd   : > { %v994_v26 = vpop.f32.mrb[12].mxu1  ;;  %2350 = vmatprep.mubr.msk.bf16.mxu0 %vm3061_vm0, %v4243_v34 }
 0x3be   : > { %v1015_v42 = vsub.f32 %v994_v26, %v4304_v40  ;;  %v2316_v63 = vpop.f32.mrb[13].mxu1 }
 0x3bf   : > { %v997_v29 = vpop.f32.mrb[14].mxu1 }
 0x3c0   : > { %v1016_v6 = vsub.f32 %v997_v29, %v4305_v56  ;;  %v2317_v35 = vpop.f32.mrb[15].mxu1 }
 0x3c2   : > { %v1022_v53 = vpack.c.bf16 %v1016_v6, %v1015_v42 }
 0x3c4   : > { %2351 = vmatmul.mubr.bf16.gmra.mrb[36].mxu0 %v1022_v53 }
 0x3c5   : > { %v1002_v0 = vpop.f32.mrb[16].mxu1  ;;  %2354 = vmatprep.mubr.msk.bf16.mxu0 %vm3061_vm0, %v4243_v34 }
 0x3c6   : > { %v1017_v8 = vsub.f32 %v1002_v0, %v4306_v7  ;;  %v2320_v18 = vpop.f32.mrb[17].mxu1 }
 0x3c7   : > { %v1005_v25 = vpop.f32.mrb[18].mxu1 }
 0x3c8   : > { %v1018_v54 = vsub.f32 %v1005_v25, %v4307_v22  ;;  %v2321_v24 = vpop.f32.mrb[19].mxu1 }
 0x3ca   : > { %v1023_v48 = vpack.c.bf16 %v1018_v54, %v1017_v8 }
 0x3cc   : > { %2355 = vmatmul.mubr.bf16.gmra.mrb[40].mxu0 %v1023_v48 }
 0x3cd   : > { %2386 = vmatprep.mubr.msk.bf16.mxu0 %vm3061_vm0, %v4243_v34 }
 0x47f   : > { %v1106_v19 = vpop.f32.mrb[24].mxu0 }
 0x480   : > { %v1145_v20 = vadd.f32 %v1106_v19, %v3503_v44  ;;  %v2340_v46 = vpop.f32.mrb[25].mxu0 }
 0x481   : > { %v1109_v37 = vpop.f32.mrb[26].mxu0 }
 0x482   : > { %v3877_v47 = vmax.f32 %v1145_v20, 0.0  ;;  %v1146_v45 = vadd.f32 %v3499_v41, %v1109_v37  ;;  %v2341_v30 = vpop.f32.mrb[27].mxu0 }
 0x484   : > { %v1156_v39 = vmax.f32 %v1146_v45, 0.0  ;;  %v4241_v33 = vrot.slane %v3877_v47, 1  ;;  %v4242_v43 = vrot.slane %v3877_v47, 7 }
 0x486   : > { %v1165_v21 = vpack.c.bf16 %v1156_v39, %v3877_v47  ;;  %v1228_v17 = vrot.slane %v1156_v39, 1  ;;  %v1248_v26 = vrot.slane %v1156_v39, 7 }
 0x487   : > { %v1114_v40 = vpop.f32.mrb[28].mxu0 }
 0x488   : > { %v1147_v42 = vadd.f32 %v1114_v40, %v3517_v59  ;;  %v2344_v63 = vpop.f32.mrb[29].mxu0  ;;  %2359 = vmatpush3.bf16.msra.mxu1 %v1165_v21  ;;  %v3888_v29 = vsel %vm850_vm1, %v4241_v33, %v1228_v17  ;;  %v3894_v56 = vsel %vm871_vm2, %v4242_v43, %v1248_v26 }
 0x489   : > { %v1117_v6 = vpop.f32.mrb[30].mxu0  ;;  %2360 = vmatprep.subr.bf16.mxu1 %v4243_v34 }
 0x48a   : > { %v1157_v35 = vmax.f32 %v1147_v42, 0.0  ;;  %v1148_v53 = vadd.f32 %v3513_v55, %v1117_v6  ;;  %v2345_v0 = vpop.f32.mrb[31].mxu0 }
 0x48c   : > { %v1229_v7 = vrot.slane %v1157_v35, 1  ;;  %v1249_v8 = vrot.slane %v1157_v35, 7  ;;  %v1158_v18 = vmax.f32 %v1148_v53, 0.0 }
 0x48e   : > { %v1166_v25 = vpack.c.bf16 %v1158_v18, %v1157_v35  ;;  %v1230_v22 = vrot.slane %v1158_v18, 1  ;;  %v1250_v54 = vrot.slane %v1158_v18, 7  ;;  %v3900_v24 = vsel %vm850_vm1, %v1228_v17, %v1229_v7 }
 0x48f   : > { %v1122_v48 = vpop.f32.mrb[32].mxu0  ;;  %v3908_v20 = vsel %vm871_vm2, %v1248_v26, %v1249_v8 }
 0x490   : > { %v1149_v46 = vadd.f32 %v1122_v48, %v3557_v13  ;;  %v2348_v37 = vpop.f32.mrb[33].mxu0  ;;  %2361 = vmatpush3.bf16.msra.mxu1 %v1166_v25  ;;  %v3913_v45 = vsel %vm850_vm1, %v1229_v7, %v1230_v22  ;;  %v3917_v30 = vsel %vm871_vm2, %v1249_v8, %v1250_v54 }
 0x491   : > { %v1125_v39 = vpop.f32.mrb[34].mxu0  ;;  %2362 = vmatprep.subr.bf16.mxu1 %v4243_v34 }
 0x492   : > { %v1159_v17 = vmax.f32 %v1149_v46, 0.0  ;;  %v1150_v26 = vadd.f32 %v3550_v9, %v1125_v39  ;;  %v2349_v40 = vpop.f32.mrb[35].mxu0 }
 0x494   : > { %v1231_v42 = vrot.slane %v1159_v17, 1  ;;  %v1251_v63 = vrot.slane %v1159_v17, 7  ;;  %v1160_v6 = vmax.f32 %v1150_v26, 0.0 }
 0x496   : > { %v1167_v35 = vpack.c.bf16 %v1160_v6, %v1159_v17  ;;  %v1232_v53 = vrot.slane %v1160_v6, 1  ;;  %v1252_v0 = vrot.slane %v1160_v6, 7  ;;  %v3927_v7 = vsel %vm850_vm1, %v1230_v22, %v1231_v42 }
 0x497   : > { %v1130_v8 = vpop.f32.mrb[36].mxu0  ;;  %v3935_v25 = vsel %vm871_vm2, %v1250_v54, %v1251_v63  ;;  %v4317_v60 = vsel %vm3542_vm5, %v3927_v7, %v3917_v30 }
 0x498   : > { %v1151_v48 = vadd.f32 %v1130_v8, %v3598_v32  ;;  %v2352_v46 = vpop.f32.mrb[37].mxu0  ;;  %2363 = vmatpush3.bf16.msra.mxu1 %v1167_v35  ;;  %v3940_v37 = vsel %vm850_vm1, %v1231_v42, %v1232_v53  ;;  %v3944_v22 = vsel %vm871_vm2, %v1251_v63, %v1252_v0 }
 0x499   : > { %v1133_v39 = vpop.f32.mrb[38].mxu0  ;;  %2364 = vmatprep.subr.bf16.mxu1 %v4243_v34  ;;  %v4318_v1 = vsel %vm3546_vm6, %v3940_v37, %v3935_v25 }
 0x49a   : > { %v1161_v17 = vmax.f32 %v1151_v48, 0.0  ;;  %v1152_v26 = vadd.f32 %v3591_v28, %v1133_v39  ;;  %v2353_v40 = vpop.f32.mrb[39].mxu0 }
 0x49c   : > { %v1233_v6 = vrot.slane %v1161_v17, 1  ;;  %v1253_v35 = vrot.slane %v1161_v17, 7  ;;  %v1162_v42 = vmax.f32 %v1152_v26, 0.0 }
 0x49e   : > { %v1168_v8 = vpack.c.bf16 %v1162_v42, %v1161_v17  ;;  %v1234_v46 = vrot.slane %v1162_v42, 1  ;;  %v1254_v18 = vrot.slane %v1162_v42, 7  ;;  %v3954_v63 = vsel %vm850_vm1, %v1232_v53, %v1233_v6 }
 0x49f   : > { %v1138_v21 = vpop.f32.mrb[40].mxu0  ;;  %v3962_v48 = vsel %vm871_vm2, %v1252_v0, %v1253_v35  ;;  %v4319_v4 = vsel %vm3552_vm7, %v3954_v63, %v3944_v22 }
 0x4a0   : > { %v1153_v39 = vadd.f32 %v1138_v21, %v3630_v58  ;;  %v2356_v26 = vpop.f32.mrb[41].mxu0  ;;  %2365 = vmatpush3.bf16.msra.mxu1 %v1168_v8  ;;  %v3967_v17 = vsel %vm850_vm1, %v1233_v6, %v1234_v46  ;;  %v3971_v53 = vsel %vm871_vm2, %v1253_v35, %v1254_v18 }
 0x4a1   : > { %v1141_v40 = vpop.f32.mrb[42].mxu0  ;;  %2366 = vmatprep.subr.bf16.mxu1 %v4243_v34  ;;  %v1273_v0 = vsel %vm3559_vm8, %v3967_v17, %v3962_v48 }
 0x4a2   : > { %v1163_v42 = vmax.f32 %v1153_v39, 0.0  ;;  %v1154_v21 = vadd.f32 %v3623_v51, %v1141_v40  ;;  %v2357_v8 = vpop.f32.mrb[43].mxu0  ;;  %v4308_v40 = vrot.slane %v3877_v47, 7 }
 0x4a4   : > { %v1235_v26 = vrot.slane %v1163_v42, 1  ;;  %v1255_v54 = vrot.slane %v1163_v42, 7  ;;  %v1164_v6 = vmax.f32 %v1154_v21, 0.0 }
 0x4a6   : > { %v1169_v19 = vpack.c.bf16 %v1164_v6, %v1163_v42  ;;  %v1236_v33 = vrot.slane %v1164_v6, 1  ;;  %v1256_v43 = vrot.slane %v1164_v6, 7  ;;  %v3981_v35 = vsel %vm850_vm1, %v1234_v46, %v1235_v26 }
 0x4a7   : > { %v1274_v34 = vsel %vm3632_vm10, %v3981_v35, %v3971_v53  ;;  %v3989_v39 = vsel %vm871_vm2, %v1254_v18, %v1255_v54  ;;  %v4309_v46 = vrot.slane %v3877_v47, 1  ;;  %v1546_v35 = vld [vmem:[#allocation10 + $0x8] sm:$0xff] }
 0x4a8   : > { %2367 = vmatpush3.bf16.msra.mxu1 %v1169_v19  ;;  %v1266_v42 = vsel %vm871_vm2, %v1256_v43, %v4308_v40  ;;  %v3997_v21 = vsel %vm850_vm1, %v1235_v26, %v1236_v33  ;;  %v4007_v18 = vsel %vm871_vm2, %v1255_v54, %v1256_v43  ;;  %v4310_v19 = vmov 0.0  }
 0x4a9   : > { %v4003_v8 = vsel %vm850_vm1, %v1236_v33, %v4309_v46  ;;  %2406 = vmatprep.subr.bf16.mxu1 %v4310_v19  ;;  %v1267_v6 = vsel %vm3579_vm9, %v3888_v29, %v1266_v42  ;;  %v1275_v26 = vsel %vm3636_vm11, %v3997_v21, %v3989_v39  ;;  %v4311_v42 = vld [vmem:[#allocation25_spill] sm:$0xff]  ;;  %v4312_v46 = vld [vmem:[#allocation26_spill] sm:$0xff] }
 0x4aa   : > { %v1276_v47 = vsel %vm3675_vm13, %v4003_v8, %v4007_v18  ;;  %v1550_v39 = vld [vmem:[#allocation10 + $0x28] sm:$0xff]  ;;  %v1553_v18 = vld [vmem:[#allocation10 + $0x40] sm:$0xff] }
 0x4ab   : > { %2369 = vmatmul.mubr.msk.bf16.vlgmr.msra.gmra.mrb[20].mxu1 %vm773_vm12, %v3667_v27 }
 0x4ac   : > { %2372 = vmatprep.mubr.msk.bf16.mxu1 %vm3061_vm0, %v4310_v19  ;;  %2407 = vmatpush3.bf16.msra.mxu1 %v3746_v52 }
 0x4ad   : > { %2408 = vmatprep.subr.bf16.mxu1 %v4310_v19 }
 0x4b0   : > { %2409 = vmatpush3.bf16.msra.mxu1 %v3749_v57 }
 0x4b1   : > { %2410 = vmatprep.subr.bf16.mxu1 %v4310_v19 }
 0x4b3   : > { %2373 = vmatmul.mubr.msk.bf16.gmra.mrb[24].mxu1 %vm773_vm12, %v3723_v49 }
 0x4b4   : > { %2376 = vmatprep.mubr.msk.bf16.mxu1 %vm3061_vm0, %v4310_v19  ;;  %2411 = vmatpush3.bf16.msra.mxu1 %v3753_v2 }
 0x4b5   : > { %2412 = vmatprep.subr.bf16.mxu1 %v4310_v19 }
 0x4b8   : > { %2413 = vmatpush3.bf16.msra.mxu1 %v3757_v3 }
 0x4b9   : > { %2414 = vmatprep.subr.bf16.mxu1 %v4310_v19 }
 0x4bb   : > { %2377 = vmatmul.mubr.msk.bf16.gmra.mrb[28].mxu1 %vm773_vm12, %v3730_v50 }
 0x4bc   : > { %2415 = vmatpush3.bf16.msra.mxu1 %v3761_v10  ;;  %2422 = vmatprep.mubr.msk.bf16.mxu1 %vm3061_vm0, %v4310_v19 }
 0x4bd   : > { %2416 = vmatprep.subr.bf16.mxu1 %v4310_v19 }
 0x4c0   : > { %2417 = vmatpush3.bf16.msra.mxu1 %v3765_v12 }
 0x4c1   : > { %2418 = vmatprep.subr.bf16.mxu1 %v4310_v19 }
 0x4c4   : > { %2419 = vmatpush3.bf16.msra.mxu1 %v3808_v15 }
 0x4c5   : > { %2420 = vmatprep.subr.bf16.mxu1 %v4310_v19 }
 0x4c8   : > { %2421 = vmatpush3.bf16.msra.mxu1 %v3812_v16 }
 0x57e   : > { %v1204_v36 = vpop.f32.mrb[20].mxu1 }
 0x57f   : > { %v2370_v23 = vpop.f32.mrb[21].mxu1 }
 0x580   : > { %v1207_v52 = vpop.f32.mrb[22].mxu1 }
 0x581   : > { %v1277_v57 = vpack.c.bf16 %v1207_v52, %v1204_v36  ;;  %v2371_v2 = vpop.f32.mrb[23].mxu1  ;;  %v4313_v36 = vld [vmem:[#allocation27_spill] sm:$0xff] }
 0x583   : > { %2381 = vmatpush3.bf16.msra.mxu0 %v1277_v57 }
 0x584   : > { %2382 = vmatprep.subr.bf16.mxu0 %v4310_v19 }
 0x586   : > { %v1212_v3 = vpop.f32.mrb[24].mxu1 }
 0x587   : > { %v2374_v10 = vpop.f32.mrb[25].mxu1 }
 0x588   : > { %v1215_v33 = vpop.f32.mrb[26].mxu1 }
 0x589   : > { %v1278_v12 = vpack.c.bf16 %v1215_v33, %v1212_v3  ;;  %v2375_v43 = vpop.f32.mrb[27].mxu1  ;;  %v4315_v3 = vsel %vm3519_vm3, %v3900_v24, %v3894_v56 }
 0x58b   : > { %2383 = vmatpush3.bf16.msra.mxu0 %v1278_v12 }
 0x58c   : > { %2384 = vmatprep.subr.bf16.mxu0 %v4310_v19 }
 0x58e   : > { %v1220_v15 = vpop.f32.mrb[28].mxu1 }
 0x58f   : > { %v2378_v29 = vpop.f32.mrb[29].mxu1 }
 0x590   : > { %v1223_v54 = vpop.f32.mrb[30].mxu1 }
 0x591   : > { %v1279_v16 = vpack.c.bf16 %v1223_v54, %v1220_v15  ;;  %v2379_v40 = vpop.f32.mrb[31].mxu1 }
 0x593   : > { %2385 = vmatpush3.bf16.msra.mxu0 %v1279_v16 }
 0x594   : > { %2442 = vmatprep.subr.bf16.mxu0 %v4310_v19 }
 0x596   : > { %2387 = vmatmul.mubr.msk.bf16.vlgmr.msra.gmra.mrb[44].mxu0 %vm920_vm14, %v3773_v38  ;;  %v4314_v38 = vld [vmem:[#allocation28_spill] sm:$0xff] }
 0x597   : > { %2390 = vmatprep.mubr.msk.bf16.mxu0 %vm3061_vm0, %v4310_v19 }
 0x59e   : > { %2391 = vmatmul.mubr.msk.bf16.gmra.mrb[48].mxu0 %vm920_vm14, %v4311_v42 }
 0x59f   : > { %2394 = vmatprep.mubr.msk.bf16.mxu0 %vm3061_vm0, %v4310_v19 }
 0x5a6   : > { %2395 = vmatmul.mubr.msk.bf16.gmra.mrb[52].mxu0 %vm920_vm14, %v4312_v46 }
 0x5a7   : > { %2398 = vmatprep.mubr.msk.bf16.mxu0 %vm3061_vm0, %v4310_v19 }
 0x5ae   : > { %2399 = vmatmul.mubr.msk.bf16.gmra.mrb[56].mxu0 %vm920_vm14, %v4313_v36 }
 0x5af   : > { %2402 = vmatprep.mubr.msk.bf16.mxu0 %vm3061_vm0, %v4310_v19 }
 0x5b6   : > { %2403 = vmatmul.mubr.msk.bf16.gmra.mrb[60].mxu0 %vm920_vm14, %v4314_v38 }
 0x5b7   : > { %2452 = vmatprep.mubr.msk.bf16.mxu0 %vm3061_vm0, %v4310_v19 }
 0x669   : > { %v1314_v23 = vpop.f32.mrb[44].mxu0 }
 0x66a   : > { %v1353_v52 = vsub.f32 %v1314_v23, %v1267_v6  ;;  %v2388_v57 = vpop.f32.mrb[45].mxu0  ;;  %v4316_v6 = vsel %vm3536_vm4, %v3913_v45, %v3908_v20  ;;  %v1547_v23 = vld [vmem:[#allocation10 + $0x10] sm:$0xff] }
 0x66b   : > { %v1317_v2 = vpop.f32.mrb[46].mxu0  ;;  %v2597_v57 = vpack.c.bf16 %v1548_v62, %v1547_v23 }
 0x66c   : > { %v1354_v10 = vsub.f32 %v1317_v2, %v4315_v3  ;;  %v2389_v33 = vpop.f32.mrb[47].mxu0  ;;  %v1549_v2 = vld [vmem:[#allocation10 + $0x20] sm:$0xff] }
 0x66d   : > { %v2601_v21 = vpack.c.bf16 %v1550_v39, %v1549_v2  ;;  %v1556_v33 = vld [vmem:[#allocation10 + $0x58] sm:$0xff] }
 0x66e   : > { %v1363_v12 = vpack.c.bf16 %v1354_v10, %v1353_v52  ;;  %v1555_v10 = vld [vmem:[#allocation10 + $0x50] sm:$0xff] }
 0x670   : > { %2423 = vmatmul.mubr.bf16.vlgmr.msra.gmra.mrb[32].mxu1 %v1363_v12  ;;  %v2613_v12 = vpack.c.bf16 %v1556_v33, %v1555_v10 }
 0x671   : > { %v1322_v43 = vpop.f32.mrb[48].mxu0  ;;  %2426 = vmatprep.mubr.msk.bf16.mxu1 %vm3061_vm0, %v4310_v19 }
 0x672   : > { %v1355_v15 = vsub.f32 %v1322_v43, %v4316_v6  ;;  %v2392_v29 = vpop.f32.mrb[49].mxu0  ;;  %v1557_v43 = vld [vmem:[#allocation10 + $0x60] sm:$0xff]  ;;  %v1558_v6 = vld [vmem:[#allocation10 + $0x68] sm:$0xff] }
 0x673   : > { %v1325_v54 = vpop.f32.mrb[50].mxu0  ;;  %v1559_v29 = vld [vmem:[#allocation10 + $0x70] sm:$0xff] }
 0x674   : > { %v1356_v56 = vsub.f32 %v1325_v54, %v4317_v60  ;;  %v2393_v24 = vpop.f32.mrb[51].mxu0  ;;  %v1560_v54 = vld [vmem:[#allocation10 + $0x78] sm:$0xff] }
 0x675   : > { %v2621_v60 = vpack.c.bf16 %v1560_v54, %v1559_v29 }
 0x676   : > { %v1364_v16 = vpack.c.bf16 %v1356_v56, %v1355_v15  ;;  %v2617_v15 = vpack.c.bf16 %v1558_v6, %v1557_v43  ;;  %v1534_v43 = vld [vmem:[#allocation8 + $0x28] sm:$0xff] }
 0x678   : > { %2427 = vmatmul.mubr.bf16.gmra.mrb[36].mxu1 %v1364_v16 }
 0x679   : > { %v1330_v40 = vpop.f32.mrb[52].mxu0  ;;  %2430 = vmatprep.mubr.msk.bf16.mxu1 %vm3061_vm0, %v4310_v19 }
 0x67a   : > { %v1357_v20 = vsub.f32 %v1330_v40, %v4318_v1  ;;  %v2396_v45 = vpop.f32.mrb[53].mxu0 }
 0x67b   : > { %v1333_v42 = vpop.f32.mrb[54].mxu0 }
 0x67c   : > { %v1358_v30 = vsub.f32 %v1333_v42, %v4319_v4  ;;  %v2397_v7 = vpop.f32.mrb[55].mxu0 }
 0x67e   : > { %v1365_v46 = vpack.c.bf16 %v1358_v30, %v1357_v20 }
 0x680   : > { %2431 = vmatmul.mubr.bf16.gmra.mrb[40].mxu1 %v1365_v46 }
 0x681   : > { %v1338_v36 = vpop.f32.mrb[56].mxu0  ;;  %2434 = vmatprep.mubr.msk.bf16.mxu1 %vm3061_vm0, %v4310_v19 }
 0x682   : > { %v1359_v5 = vsub.f32 %v1338_v36, %v1273_v0  ;;  %v2400_v25 = vpop.f32.mrb[57].mxu0  ;;  %v1545_v0 = vld [vmem:[#allocation10] sm:$0xff] }
 0x683   : > { %v1341_v37 = vpop.f32.mrb[58].mxu0  ;;  %v2593_v52 = vpack.c.bf16 %v1546_v35, %v1545_v0 }
 0x684   : > { %v1360_v11 = vsub.f32 %v1341_v37, %v1274_v34  ;;  %v2401_v22 = vpop.f32.mrb[59].mxu0 }
 0x685   : > { %2594 = vmatprep.subr.bf16.mxu1 %v2593_v52 }
 0x686   : > { %v1366_v63 = vpack.c.bf16 %v1360_v11, %v1359_v5  ;;  %2596 = vmatpush3.bf16.msra.mxu1 %v2593_v52 }
 0x687   : > { %2598 = vmatprep.subr.bf16.mxu1 %v2597_v57 }
 0x688   : > { %2435 = vmatmul.mubr.bf16.gmra.mrb[44].mxu1 %v1366_v63 }
 0x689   : > { %v1346_v38 = vpop.f32.mrb[60].mxu0  ;;  %2438 = vmatprep.mubr.msk.bf16.mxu1 %vm3061_vm0, %v4310_v19 }
 0x68a   : > { %v1361_v14 = vsub.f32 %v1346_v38, %v1275_v26  ;;  %v2404_v48 = vpop.f32.mrb[61].mxu0  ;;  %v1552_v26 = vld [vmem:[#allocation10 + $0x38] sm:$0xff]  ;;  %2600 = vmatpush3.bf16.msra.mxu1 %v2597_v57 }
 0x68b   : > { %v1349_v17 = vpop.f32.mrb[62].mxu0  ;;  %2602 = vmatprep.subr.bf16.mxu1 %v2601_v21  ;;  %v2605_v8 = vpack.c.bf16 %v1552_v26, %v1551_v31 }
 0x68c   : > { %v1362_v34 = vsub.f32 %v1349_v17, %v1276_v47  ;;  %v2405_v61 = vpop.f32.mrb[63].mxu0  ;;  %v1554_v47 = vld [vmem:[#allocation10 + $0x48] sm:$0xff] }
 0x68d   : > { %v2609_v3 = vpack.c.bf16 %v1554_v47, %v1553_v18  ;;  %v1531_v18 = vld [vmem:[#allocation8 + $0x10] sm:$0xff]  ;;  %v1532_v47 = vld [vmem:[#allocation8 + $0x18] sm:$0xff] }
 0x68e   : > { %v1367_v53 = vpack.c.bf16 %v1362_v34, %v1361_v14  ;;  %2604 = vmatpush3.bf16.msra.mxu1 %v2601_v21  ;;  %v2629_v10 = vpack.c.bf16 %v1532_v47, %v1531_v18 }
 0x68f   : > { %2606 = vmatprep.subr.bf16.mxu1 %v2605_v8 }
 0x690   : > { %2439 = vmatmul.mubr.bf16.gmra.mrb[48].mxu1 %v1367_v53 }
 0x692   : > { %2608 = vmatpush3.bf16.msra.mxu1 %v2605_v8 }
 0x693   : > { %2610 = vmatprep.subr.bf16.mxu1 %v2609_v3 }
 0x696   : > { %2612 = vmatpush3.bf16.msra.mxu1 %v2609_v3 }
 0x697   : > { %2614 = vmatprep.subr.bf16.mxu1 %v2613_v12 }
 0x69a   : > { %2616 = vmatpush3.bf16.msra.mxu1 %v2613_v12  ;;  %v1533_v12 = vld [vmem:[#allocation8 + $0x20] sm:$0xff] }
 0x69b   : > { %2618 = vmatprep.subr.bf16.mxu1 %v2617_v15  ;;  %v2633_v6 = vpack.c.bf16 %v1534_v43, %v1533_v12 }
 0x69e   : > { %2620 = vmatpush3.bf16.msra.mxu1 %v2617_v15  ;;  %v1535_v15 = vld [vmem:[#allocation8 + $0x30] sm:$0xff] }
 0x69f   : > { %2622 = vmatprep.subr.bf16.mxu1 %v2621_v60 }
 0x6a2   : > { %2624 = vmatpush3.bf16.msra.mxu1 %v2621_v60 }
 0x743   : > { %v1402_v56 = vpop.f32.mrb[32].mxu1 }
 0x744   : > { %v1441_v24 = vadd.f32 %v1402_v56, %v3503_v44  ;;  %v2424_v16 = vpop.f32.mrb[33].mxu1  ;;  %v1537_v56 = vld [vmem:[#allocation8 + $0x40] sm:$0xff] }
 0x745   : > { %v1405_v40 = vpop.f32.mrb[34].mxu1 }
 0x746   : > { %v1442_v1 = vadd.f32 %v3499_v41, %v1405_v40  ;;  %v2425_v20 = vpop.f32.mrb[35].mxu1  ;;  %v1451_v45 = vmax.f32 %v1441_v24, 0.0  ;;  %v1538_v24 = vld [vmem:[#allocation8 + $0x48] sm:$0xff] }
 0x747   : > { %v1539_v20 = vld [vmem:[#allocation8 + $0x50] sm:$0xff] }
 0x748   : > { %v1452_v42 = vmax.f32 %v1442_v1, 0.0  ;;  %v2641_v1 = vpack.c.bf16 %v1538_v24, %v1537_v56 }
 0x74a   : > { %v1461_v4 = vpack.c.bf16 %v1452_v42, %v1451_v45  ;;  %v1540_v45 = vld [vmem:[#allocation8 + $0x58] sm:$0xff] }
 0x74b   : > { %v1410_v30 = vpop.f32.mrb[36].mxu1 }
 0x74c   : > { %v1443_v7 = vadd.f32 %v1410_v30, %v3517_v59  ;;  %v2428_v46 = vpop.f32.mrb[37].mxu1  ;;  %2443 = vmatpush3.bf16.msra.mxu0 %v1461_v4  ;;  %v2645_v4 = vpack.c.bf16 %v1540_v45, %v1539_v20 }
 0x74d   : > { %v1413_v36 = vpop.f32.mrb[38].mxu1  ;;  %2444 = vmatprep.subr.bf16.mxu0 %v4310_v19  ;;  %v1541_v46 = vld [vmem:[#allocation8 + $0x60] sm:$0xff] }
 0x74e   : > { %v1444_v5 = vadd.f32 %v3513_v55, %v1413_v36  ;;  %v2429_v25 = vpop.f32.mrb[39].mxu1  ;;  %v1453_v44 = vmax.f32 %v1443_v7, 0.0  ;;  %v1523_v7 = vld [vmem:[%s3399_s22] sm:$0xff]  ;;  %v1542_v36 = vld [vmem:[#allocation8 + $0x68] sm:$0xff] }
 0x750   : > { %v1454_v37 = vmax.f32 %v1444_v5, 0.0 }
 0x752   : > { %v1462_v11 = vpack.c.bf16 %v1454_v37, %v1453_v44  ;;  %v2649_v44 = vpack.c.bf16 %v1542_v36, %v1541_v46  ;;  %v1543_v37 = vld [vmem:[#allocation8 + $0x70] sm:$0xff] }
 0x753   : > { %v1418_v22 = vpop.f32.mrb[40].mxu1 }
 0x754   : > { %v1445_v41 = vadd.f32 %v1418_v22, %v3557_v13  ;;  %v2432_v63 = vpop.f32.mrb[41].mxu1  ;;  %2445 = vmatpush3.bf16.msra.mxu0 %v1462_v11  ;;  %v1544_v11 = vld [vmem:[#allocation8 + $0x78] sm:$0xff] }
 0x755   : > { %v1421_v38 = vpop.f32.mrb[42].mxu1  ;;  %2446 = vmatprep.subr.bf16.mxu0 %v4310_v19  ;;  %v2653_v22 = vpack.c.bf16 %v1544_v11, %v1543_v37  ;;  %v1525_v63 = vld [vmem:[%s3399_s22 + $0x10] sm:$0xff] }
 0x756   : > { %v1446_v59 = vadd.f32 %v3550_v9, %v1421_v38  ;;  %v2433_v14 = vpop.f32.mrb[43].mxu1  ;;  %v1455_v48 = vmax.f32 %v1445_v41, 0.0  ;;  %v1524_v41 = vld [vmem:[%s3399_s22 + $0x8] sm:$0xff]  ;;  %v1526_v38 = vld [vmem:[%s3399_s22 + $0x18] sm:$0xff] }
 0x757   : > { %v1528_v14 = vld [vmem:[%s3399_s22 + $0x28] sm:$0xff] }
 0x758   : > { %v1456_v17 = vmax.f32 %v1446_v59, 0.0  ;;  %v1527_v59 = vld [vmem:[%s3399_s22 + $0x20] sm:$0xff]  ;;  %s2042_s22 = sshll.u32 %s3738_s29, 3  ;;  %s4322_s29 = sld [smem:[#allocation32_spill]] }
 0x759   : > { %s537_s24 = scalar_lea.vmem %s4320_s21, %s2042_s22 }
 0x75a   : > { %v1463_v34 = vpack.c.bf16 %v1456_v17, %v1455_v48  ;;  %v3062_v48 = vmov 0.0|0.0   ;;  %v2078_v17 = vld [vmem:[%s4219_s6] ss:$0 sm:$0xff] }
 0x75b   : > { %v1426_v61 = vpop.f32.mrb[44].mxu1 }
 0x75c   : > { %v1447_v55 = vadd.f32 %v1426_v61, %v3598_v32  ;;  %v2436_v53 = vpop.f32.mrb[45].mxu1  ;;  %2447 = vmatpush3.bf16.msra.mxu0 %v1463_v34 }
 0x75d   : > { %v1429_v0 = vpop.f32.mrb[46].mxu1  ;;  %2448 = vmatprep.subr.bf16.mxu0 %v4310_v19 }
 0x75e   : > { %v1448_v13 = vadd.f32 %v3591_v28, %v1429_v0  ;;  %v2437_v35 = vpop.f32.mrb[47].mxu1  ;;  %v1457_v23 = vmax.f32 %v1447_v55, 0.0  ;;  %v1529_v28 = vld [vmem:[#allocation8] sm:$0xff]  ;;  %s4171_s28 = scalar_lea.hbm %s4322_s29, %s2081_s30 }
 0x760   : > { %v1458_v52 = vmax.f32 %v1448_v13, 0.0 }
 0x762   : > { %v1464_v62 = vpack.c.bf16 %v1458_v52, %v1457_v23 }
 0x763   : > { %v1434_v57 = vpop.f32.mrb[48].mxu1 }
 0x764   : > { %v1449_v9 = vadd.f32 %v1434_v57, %v3630_v58  ;;  %v2440_v2 = vpop.f32.mrb[49].mxu1  ;;  %2449 = vmatpush3.bf16.msra.mxu0 %v1464_v62 }
 0x765   : > { %v1437_v39 = vpop.f32.mrb[50].mxu1  ;;  %2450 = vmatprep.subr.bf16.mxu0 %v4310_v19 }
 0x766   : > { %v1450_v32 = vadd.f32 %v3623_v51, %v1437_v39  ;;  %v2441_v21 = vpop.f32.mrb[51].mxu1  ;;  %v1459_v31 = vmax.f32 %v1449_v9, 0.0  ;;  %v1530_v51 = vld [vmem:[#allocation8 + $0x8] sm:$0xff] }
 0x767   : > { %v2625_v58 = vpack.c.bf16 %v1530_v51, %v1529_v28  ;;  %v1770_v51 = vld [vmem:[%s537_s24] sm:$0xff] }
 0x768   : > { %v1460_v26 = vmax.f32 %v1450_v32, 0.0 }
 0x769   : > { %2626 = vmatprep.subr.bf16.mxu1 %v2625_v58 }
 0x76a   : > { %v1465_v8 = vpack.c.bf16 %v1460_v26, %v1459_v31 }
 0x76c   : > { %2451 = vmatpush3.bf16.msra.mxu0 %v1465_v8 }
 0x76f   : > { %2453 = vmatmul.mubr.msk.bf16.vlgmr.msra.gmra.mrb[64].mxu0 %vm773_vm12, %v3667_v27 }
 0x770   : > { %2456 = vmatprep.mubr.msk.bf16.mxu0 %vm3061_vm0, %v4310_v19 }
 0x777   : > { %2457 = vmatmul.mubr.msk.bf16.gmra.mrb[68].mxu0 %vm773_vm12, %v3723_v49 }
 0x778   : > { %2460 = vmatprep.mubr.msk.bf16.mxu0 %vm3061_vm0, %v4310_v19 }
 0x77f   : > { %2461 = vmatmul.mubr.msk.bf16.gmra.mrb[72].mxu0 %vm773_vm12, %v3730_v50  ;;  %v1536_v50 = vld [vmem:[#allocation8 + $0x38] sm:$0xff] }
 0x780   : > { %v2637_v54 = vpack.c.bf16 %v1536_v50, %v1535_v15 }
 0x842   : > { %v1500_v3 = vpop.f32.mrb[64].mxu0 }
 0x843   : > { %v2454_v27 = vpop.f32.mrb[65].mxu0  ;;  %2496 = vmatprep.mubr.f32.mxu1 %v1500_v3 }
 0x844   : > { %v1503_v33 = vpop.f32.mrb[66].mxu0 }
 0x845   : > { %2497 = vmatmul.mubr.f32.vlgmr.msra.gmra.mrb[52].mxu1 %v1503_v33  ;;  %v2455_v49 = vpop.f32.mrb[67].mxu0 }
 0x846   : > { %2628 = vmatpush3.bf16.msra.mxu1 %v2625_v58 }
 0x847   : > { %2630 = vmatprep.subr.bf16.mxu1 %v2629_v10 }
 0x84a   : > { %2632 = vmatpush3.bf16.msra.mxu1 %v2629_v10  ;;  %v1508_v29 = vpop.f32.mrb[68].mxu0 }
 0x84b   : > { %2634 = vmatprep.subr.bf16.mxu1 %v2633_v6  ;;  %v2458_v60 = vpop.f32.mrb[69].mxu0  ;;  %2499 = vmatprep.mubr.f32.mxu1 %v1508_v29 }
 0x84c   : > { %v1511_v16 = vpop.f32.mrb[70].mxu0 }
 0x84d   : > { %v2459_v40 = vpop.f32.mrb[71].mxu0  ;;  %2500 = vmatmul.mubr.f32.gmra.mrb[54].mxu1 %v1511_v16 }
 0x84e   : > { %2636 = vmatpush3.bf16.msra.mxu1 %v2633_v6 }
 0x84f   : > { %2638 = vmatprep.subr.bf16.mxu1 %v2637_v54 }
 0x852   : > { %2640 = vmatpush3.bf16.msra.mxu1 %v2637_v54  ;;  %v1516_v42 = vpop.f32.mrb[72].mxu0 }
 0x853   : > { %2642 = vmatprep.subr.bf16.mxu1 %v2641_v1  ;;  %v2462_v30 = vpop.f32.mrb[73].mxu0  ;;  %2502 = vmatprep.mubr.f32.mxu1 %v1516_v42 }
 0x854   : > { %v1519_v5 = vpop.f32.mrb[74].mxu0 }
 0x855   : > { %2503 = vmatmul.mubr.f32.gmra.mrb[56].mxu1 %v1519_v5  ;;  %v2463_v25 = vpop.f32.mrb[75].mxu0 }
 0x856   : > { %2644 = vmatpush3.bf16.msra.mxu1 %v2641_v1  ;;  %2537 = vmatprep.mubr.f32.mxu1 %v1523_v7 }
 0x857   : > { %2646 = vmatprep.subr.bf16.mxu1 %v2645_v4 }
 0x85a   : > { %2648 = vmatpush3.bf16.msra.mxu1 %v2645_v4 }
 0x85b   : > { %2650 = vmatprep.subr.bf16.mxu1 %v2649_v44 }
 0x85e   : > { %2652 = vmatpush3.bf16.msra.mxu1 %v2649_v44 }
 0x85f   : > { %2654 = vmatprep.subr.bf16.mxu1 %v2653_v22 }
 0x862   : > { %2656 = vmatpush3.bf16.msra.mxu1 %v2653_v22 }
 0x863   : > { %2657 = vmatprep.subr.bf16.mxu1 %v3062_v48 }
 0x865   : > { %2538 = vmatmul.mubr.f32.vlgmr.msra.gmra.mrb[52].mxu1 %v1524_v41 }
 0x866   : > { %2540 = vmatprep.mubr.f32.mxu1 %v1525_v63 }
 0x869   : > { %2541 = vmatmul.mubr.f32.gmra.mrb[54].mxu1 %v1526_v38 }
 0x86a   : > { %2543 = vmatprep.mubr.f32.mxu1 %v1527_v59 }
 0x86d   : > { %2544 = vmatmul.mubr.f32.gmra.mrb[56].mxu1 %v1528_v14 }
 0x86e   : > { %2558 = vmatprep.mubr.msk.f32.mxu1 %vm3061_vm0, %v4310_v19 }
 0x938   : > { %v2539_v34 = vpop.f32.mrb[52].mxu1 }
 0x939   : > { %v1759_v61 = vadd.f32 %v2539_v34, %v2078_v17  ;;  %v1722_v55 = vpop.f32.mrb[53].mxu1 }
 0x93a   : > { %v1758_v53 = vadd.f32 %v2078_v17, %v1722_v55 }
 0x93b   : > { %v1765_v0 = vmax.f32 %v1759_v61, 0.0 }
 0x93c   : > { %v1764_v13 = vmax.f32 %v1758_v53, 0.0  ;;  %v2542_v35 = vpop.f32.mrb[54].mxu1 }
 0x93d   : > { %v1761_v23 = vadd.f32 %v2542_v35, %v2078_v17  ;;  %v1732_v52 = vpop.f32.mrb[55].mxu1 }
 0x93e   : > { %v2658_v62 = vpack.c.bf16 %v1765_v0, %v1764_v13  ;;  %v1760_v57 = vadd.f32 %v2078_v17, %v1732_v52 }
 0x93f   : > { %v1767_v9 = vmax.f32 %v1761_v23, 0.0 }
 0x940   : > { %v1766_v19 = vmax.f32 %v1760_v57, 0.0  ;;  %2659 = vmatpush3.bf16.msra.mxu1 %v2658_v62  ;;  %v2545_v2 = vpop.f32.mrb[56].mxu1 }
 0x941   : > { %2660 = vmatprep.subr.bf16.mxu1 %v3062_v48  ;;  %v1763_v39 = vadd.f32 %v2545_v2, %v2078_v17  ;;  %v1742_v32 = vpop.f32.mrb[57].mxu1 }
 0x942   : > { %v2661_v21 = vpack.c.bf16 %v1767_v9, %v1766_v19  ;;  %v1762_v31 = vadd.f32 %v2078_v17, %v1742_v32 }
 0x943   : > { %v1769_v26 = vmax.f32 %v1763_v39, 0.0 }
 0x944   : > { %2662 = vmatpush3.bf16.msra.mxu1 %v2661_v21  ;;  %v1768_v8 = vmax.f32 %v1762_v31, 0.0 }
 0x945   : > { %2663 = vmatprep.subr.bf16.mxu1 %v3062_v48 }
 0x946   : > { %v2664_v28 = vpack.c.bf16 %v1769_v26, %v1768_v8 }
 0x948   : > { %2665 = vmatpush3.bf16.msra.mxu1 %v2664_v28 }
 0x94b   : > { %2559 = vmatmul.mubr.msk.f32.vlgmr.msra.gmra.mrb[58].mxu1 %vm920_vm14, %v1770_v51 }
 0xa1e   : > { %v1840_v58 = vpop.f32.mrb[58].mxu1 }
 0xa1f   : > { %1844 = vst [vmem:[%s528_s27] sm:$0xff] %v1840_v58  ;;  %v2560_v18 = vpop.f32.mrb[59].mxu1 }
 0xa20   : > { %2979 = shalt.err (!%p2976_p4)
}
 0xa21   : > { %s2980_s12 = scalar_lea.hbm %s4171_s28, 128  ;;  %s2984_s23 = scalar_lea.hbm %s4322_s29, 256 }
 0xa22   : > { %p2981_p7 = scmp.ne.s32.totalorder %s4171_s28, %s2980_s12  ;;  %p2985_p13 = scmp.lt.u32.totalorder %s4171_s28, %s4322_s29 }
 0xa23   : > { %p2986_p0 = scmp.lt.u32.totalorder %s2984_s23, %s2980_s12  ;;  %p2988_p3 = scmp.lt.u32.totalorder %s2980_s12, %s4171_s28 }
 0xa24   : > { %p2982_p6 = pnand %p2981_p7, %p4323_p9 }
 0xa25   : > { %p2987_p12 = por %p2986_p0, %p2985_p13 }
 0xa26   : > { %p2983_p11 = pneg %p2982_p6 }
 0xa27   : > { %p2989_p10 = por %p2988_p3, %p2987_p12 }
 0xa29   : > { %p2990_p8 = pnand %p2989_p10, %p2983_p11 }
 0xa2b   : > { %2993 = shalt.err (!%p2990_p8)
}
 0xa2c   : > { %2700 = dma.vmem_to_hbm [thread:$0]  (%p4323_p9), %s4166_s20, 128, %s4171_s28, %s1846_s18  }
 0xa2d PF: > { %s4324_s24 = sld [smem:[#allocation20_spill]]  ;;  %s4325_s0 = sld [smem:[#allocation24_spill]] }
 0xa2e   : > { %p4327_p5 = scmp.ge.s32.totalorder %s3048_s16, 2 }
 0xa33   : > { %s1871_s27 = sand.u32 1, %s4324_s24   ;;  %p4326_p1 = scmp.ne.s32.totalorder %s4325_s0, 0 }
 0xa34   : > { %s1872_s30 = scalar_lea.sflag [#allocation4], %s1871_s27 }
 0xa35   : > { %p2723_p2 = pnand %p4327_p5, %p4326_p1 }
 0xa37   : > { %3031 = dma.done.wait (!%p2723_p2), %s1872_s30, 128  }
 0xa38   : > { %3033 = vsyncadd (!%p2723_p2), %s1872_s30, 4294967168  ;;  %s4328_s16 = sld [smem:[#allocation21_spill]]  ;;  %s4329_s25 = sld [smem:[#allocation22_spill]] }
 0xa39   : > { %s4330_s13 = smov %s3040_s14  ;;  %s4331_s14 = smov %s3044_s15 }
 0xa3e   : > { %p30_p4 = scmp.ge.s32.totalorder %s4328_s16, 4   ;;  %s4332_s15 = smov %s4329_s25 }
 0xa40   :  { %32 = sbr.rel (!%p30_p4) target bundleno = 15 (0xf), region = 149 }
 0xa47   :  { %1877 = vsyncpa [#allocation3], 1 }
 0xa48   :  { %1879 = vsyncpa [#allocation3 + $0x1], 1 }
 0xa49   :  { %1880 = vsyncpa [#allocation6], 1 }
 0xa4a   :  { %1882 = vsyncpa [#allocation6 + $0x1], 1 }
 0xa4b   :  { %1883 = vsyncpa [#allocation9], 1 }
 0xa4c   :  { %1884 = vsyncpa [#allocation12], 1 }
 0xa4d   :  { %1886 = vsyncpa [#allocation12 + $0x1], 1 }
 0xa4e   :  { %1887 = vsyncpa [#allocation4], 1 }
 0xa4f   :  { %1889 = vsyncpa [#allocation4 + $0x1], 1 }

</bundles_post_ra>
